<compile_context>
chip_gen: v7x
topology: tpu7x:2x2x1
jax: 0.10.0
libtpu: 0.0.40
codegen_flags: <defaults>
</compile_context>

<pallas_src>
import jax
import jax.numpy as jnp
from jax import lax
from jax.experimental import pallas as pl
from jax.experimental.pallas import tpu as pltpu


# ------------------------------ Pallas kernel -------------------------------

def fused_steerable_kernel(x_ref, t_ref, w_ref, o_ref):
    """Toeplitz conv (MXU) -> sigmoid -> FC (MXU) -> sigmoid, fully fused.

    x_ref: VMEM (TB, 1024) bf16  padded flat image; last lane == 1.0 (conv bias)
    t_ref: VMEM (1024, 768) bf16 sparse-Toeplitz folded 5x5 conv (+ bias row)
    w_ref: VMEM (768, 128) bf16  fc weights (+ fc-bias row 767); cols 10.. are 0
    o_ref: VMEM (TB, 128) f32    sigmoid output (cols >= 10 junk, sliced off)
    """
    # conv as one MXU matmul, f32 accumulation
    conv = jnp.dot(x_ref[...], t_ref[...], preferred_element_type=jnp.float32)
    # inner sigmoid: exp on the EUP, approximate reciprocal on the EUP vrcp slot
    act = pl.reciprocal(1.0 + jnp.exp(-conv), approx=True)
    # force the reserved fc-bias activation column to exactly 1.0
    col = lax.broadcasted_iota(jnp.int32, act.shape, 1)
    act = jnp.where(col == act.shape[1] - 1, 1.0, act)
    # FC on the MXU, bf16 operands, f32 accumulation (bias comes from row 767)
    y = jnp.dot(act.astype(jnp.bfloat16), w_ref[...],
                preferred_element_type=jnp.float32)
    # exact divide for the final sigmoid so outputs stay within [0, 1]
    o_ref[...] = 1.0 / (1.0 + jnp.exp(-y))


# --------------------------- parameter construction -------------------------

def steerable_filter_bank(filter_size, truncation, beta):
    """Deterministic steerable basis: Gaussian envelope x angular harmonics."""
    r0 = (filter_size - 1) / 2.0
    coords = jnp.arange(filter_size, dtype=jnp.float32) - r0
    yy, xx = jnp.meshgrid(coords, coords, indexing="ij")
    rad = jnp.sqrt(xx * xx + yy * yy)
    theta = jnp.arctan2(yy, xx)
    env = jnp.exp(-(rad * rad) / (2.0 * beta * beta))
    filters = [env]                                    # angular frequency m = 0
    for m in range(1, truncation + 1):
        radial = rad ** m
        filters.append(env * radial * jnp.cos(m * theta))
        filters.append(env * radial * jnp.sin(m * theta))
    bank = jnp.stack(filters, axis=0)                  # (C, k, k)
    norm = jnp.sqrt(jnp.sum(bank * bank, axis=(1, 2), keepdims=True))
    return (bank / norm).astype(jnp.float32)


def init_params(filter_size, truncation, beta, key):
    bank = steerable_filter_bank(filter_size, truncation, beta)
    c = bank.shape[0]
    k1, k2, k3, k4 = jax.random.split(key, 4)
    return {
        "bank": bank,
        # nn.Conv2d(C, 1, kernel_size=1): weight (1, C, 1, 1) -> (C, 1), bias (1,)
        "comb_w": jax.random.normal(k1, (c, 1), jnp.float32) * (1.0 / jnp.sqrt(c)),
        "comb_b": jax.random.normal(k2, (1, 1), jnp.float32) * 0.01,
        # nn.Linear(729, 10): stored pre-transposed (729, 10).
        # NOTE: if importing real PyTorch weights (10, 729), transpose first.
        "fc_w": jax.random.normal(k3, (729, 10), jnp.float32) * (1.0 / jnp.sqrt(729.0)),
        "fc_b": jax.random.normal(k4, (1, 10), jnp.float32) * 0.01,
    }


# -------------------------------- forward pass ------------------------------

def _pick_batch_tile(b, cap=256):
    """Batch tile: multiple of 8, capped at 256, and kept <= b/2 whenever
    possible so the 'parallel' grid axis has >= 2 steps (v7x second core)."""
    if b % 8 != 0:
        return b            # small/odd batch: one full block (block dim == array dim)
    tb = 8
    while tb * 2 <= cap and b % (tb * 2) == 0 and b // (tb * 2) >= 2:
        tb *= 2
    return tb


def steerable_net_forward(x, params, filter_size):
    B, cin, H, W = x.shape
    assert cin == 1, "SteerableCNN is instantiated with 1 input channel"
    k = filter_size
    pad = (k - 1) // 2
    Hp, Wp = H + 2 * pad, W + 2 * pad            # 31, 31
    npix = H * W                                 # 729 (matches nn.Linear(729, 10))
    q_real = Hp * Wp                             # 961
    QP = pl.cdiv(q_real + 1, 128) * 128          # 1024 (extra lane = const-1 for conv bias)
    NP = pl.cdiv(npix + 1, 128) * 128            # 768  (extra column = fc-bias column)
    NO = 128                                     # lane-dense padded FC output width
    n_out = params["fc_w"].shape[1]              # 10

    # --- fold fixed steerable basis into the 1x1 combination conv (exact) ---
    kk = k * k
    bank_flat = params["bank"].reshape(-1, kk)                 # (C, 25)
    w_eff = (bank_flat.T @ params["comb_w"]).reshape(k, k)     # (5, 5)
    comb_b = params["comb_b"].reshape(())                      # scalar

    # --- sparse-Toeplitz conv matrix:  conv_flat = x_flat @ T  ---------------
    # T[q, p] = w_eff[dy, dx] where p = r*W + c, q = (r+dy)*Wp + (c+dx);
    # row QP-1 carries the conv bias (matching input lane is set to 1.0).
    r = jnp.arange(H)
    c = jnp.arange(W)
    dy = jnp.arange(k)
    dx = jnp.arange(k)
    qidx = ((r[:, None, None, None] + dy[None, None, :, None]) * Wp
            + (c[None, :, None, None] + dx[None, None, None, :]))       # (H,W,k,k)
    pidx = jnp.broadcast_to((r[:, None] * W + c[None, :])[:, :, None, None],
                            qidx.shape)
    wvals = jnp.broadcast_to(w_eff[None, None, :, :], qidx.shape)
    T = jnp.zeros((QP, NP), jnp.float32)
    T = T.at[qidx.reshape(-1), pidx.reshape(-1)].set(wvals.reshape(-1))
    T = T.at[QP - 1, :npix].set(comb_b)
    T = T.astype(jnp.bfloat16)

    # --- FC weights: (729,10) -> (768,128); fc bias folded into row NP-1 -----
    fcw = jnp.zeros((NP, NO), jnp.float32)
    fcw = fcw.at[:npix, :n_out].set(params["fc_w"])
    fcw = fcw.at[NP - 1, :n_out].set(params["fc_b"].reshape(n_out))
    fcw = fcw.astype(jnp.bfloat16)

    # --- raw padded image, flattened lane-dense, bf16 (only thing streamed) --
    xp = jnp.pad(x[:, 0], ((0, 0), (pad, pad), (pad, pad)))    # (B, 31, 31)
    xflat = jnp.pad(xp.reshape(B, q_real), ((0, 0), (0, QP - q_real)))
    xflat = xflat.at[:, QP - 1].set(1.0).astype(jnp.bfloat16)  # conv-bias lane

    tb = _pick_batch_tile(B)
    grid = (B // tb,)

    out_pad = pl.pallas_call(
        fused_steerable_kernel,
        out_shape=jax.ShapeDtypeStruct((B, NO), jnp.float32),
        grid=grid,
        in_specs=[
            pl.BlockSpec((tb, QP), lambda i: (i, 0)),     # image block (streamed)
            pl.BlockSpec((QP, NP), lambda i: (0, 0)),     # Toeplitz conv (resident)
            pl.BlockSpec((NP, NO), lambda i: (0, 0)),     # fc weights    (resident)
        ],
        out_specs=pl.BlockSpec((tb, NO), lambda i: (i, 0)),
        compiler_params=pltpu.CompilerParams(
            dimension_semantics=("parallel",)),
    )(xflat, T, fcw)

    return out_pad[:, :n_out]


# ------------------------------------ main -----------------------------------

if __name__ == "__main__":
    filter_size = 5      # odd -> padding = 2, spatial size preserved
    truncation = 2       # -> out_channels = 2*truncation + 1 = 5
    beta = 1.5

    key = jax.random.PRNGKey(0)
    k_x, k_p = jax.random.split(key)

    # Input must flatten to 729 features after the same-padded convs: 27x27.
    x = jax.random.normal(k_x, (2, 1, 27, 27), dtype=jnp.float32)
    params = init_params(filter_size, truncation, beta, k_p)

    fwd = jax.jit(lambda xx: steerable_net_forward(xx, params, filter_size))
    out = fwd(x)
    jax.block_until_ready(out)

    assert out.shape == (2, 10)
    assert bool(jnp.all(jnp.isfinite(out)))
    assert bool(jnp.all((out >= 0.0) & (out <= 1.0)))   # sigmoid range
    print("KERNEL_OK")
</pallas_src>

<mosaic_0001>
module attributes {stable_mosaic.version = 11 : i64} {
  func.func @fused_steerable_kernel(%arg0: i32, %arg1: memref<2x1024xbf16, #tpu.memory_space<vmem>>, %arg2: memref<1024x768xbf16, #tpu.memory_space<vmem>>, %arg3: memref<768x128xbf16, #tpu.memory_space<vmem>>, %arg4: memref<2x128xf32, #tpu.memory_space<vmem>>) attributes {dimension_semantics = [#tpu.dimension_semantics<parallel>], iteration_bounds = array<i64: 1>, scalar_prefetch = 0 : i64, scratch_operands = 0 : i64, tpu.core_type = #tpu.core_type<tc>, window_params = [{transform_indices = @transform_0, window_bounds = array<i64: 2, 1024>}, {pipeline_mode = #tpu.pipeline_mode<synchronous>, transform_indices = @transform_1, window_bounds = array<i64: 1024, 768>}, {pipeline_mode = #tpu.pipeline_mode<synchronous>, transform_indices = @transform_2, window_bounds = array<i64: 768, 128>}, {transform_indices = @transform_3, window_bounds = array<i64: 2, 128>}]} {
    %c0 = arith.constant 0 : index
    %c0_0 = arith.constant 0 : index
    %0 = vector.load %arg1[%c0, %c0_0] : memref<2x1024xbf16, #tpu.memory_space<vmem>>, vector<2x1024xbf16>
    %c0_1 = arith.constant 0 : index
    %c0_2 = arith.constant 0 : index
    %1 = vector.load %arg2[%c0_1, %c0_2] : memref<1024x768xbf16, #tpu.memory_space<vmem>>, vector<1024x768xbf16>
    %cst = arith.constant dense<0.000000e+00> : vector<2x768xf32>
    %2 = tpu.matmul %0, %1, %cst {dimension_numbers = #tpu.dot_dimension_numbers<[1], [0], [0], [1], [0, 0, 1, 1], [], []>} : vector<2x1024xbf16>, vector<1024x768xbf16>, vector<2x768xf32> -> vector<2x768xf32>
    %cst_3 = arith.constant 0.000000e+00 : f32
    %3 = vector.broadcast %cst_3 : f32 to vector<2x768xf32>
    %4 = arith.subf %3, %2 : vector<2x768xf32>
    %5 = math.exp %4 : vector<2x768xf32>
    %cst_4 = arith.constant 1.000000e+00 : f32
    %6 = vector.broadcast %cst_4 : f32 to vector<2x768xf32>
    %7 = arith.addf %6, %5 : vector<2x768xf32>
    %8 = tpu.reciprocal %7 {approx = true} : vector<2x768xf32> -> vector<2x768xf32>
    %9 = tpu.iota {dimensions = array<i32: 1>} : vector<2x768xi32>
    %c767_i32 = arith.constant 767 : i32
    %10 = vector.broadcast %c767_i32 : i32 to vector<2x768xi32>
    %11 = arith.cmpi eq, %9, %10 : vector<2x768xi32>
    %cst_5 = arith.constant 1.000000e+00 : f32
    %12 = vector.broadcast %cst_5 : f32 to vector<2x768xf32>
    %13 = arith.select %11, %12, %8 : vector<2x768xi1>, vector<2x768xf32>
    %14 = arith.truncf %13 : vector<2x768xf32> to vector<2x768xbf16>
    %c0_6 = arith.constant 0 : index
    %c0_7 = arith.constant 0 : index
    %15 = vector.load %arg3[%c0_6, %c0_7] : memref<768x128xbf16, #tpu.memory_space<vmem>>, vector<768x128xbf16>
    %cst_8 = arith.constant dense<0.000000e+00> : vector<2x128xf32>
    %16 = tpu.matmul %14, %15, %cst_8 {dimension_numbers = #tpu.dot_dimension_numbers<[1], [0], [0], [1], [0, 0, 1, 1], [], []>} : vector<2x768xbf16>, vector<768x128xbf16>, vector<2x128xf32> -> vector<2x128xf32>
    %cst_9 = arith.constant 0.000000e+00 : f32
    %17 = vector.broadcast %cst_9 : f32 to vector<2x128xf32>
    %18 = arith.subf %17, %16 : vector<2x128xf32>
    %19 = math.exp %18 : vector<2x128xf32>
    %cst_10 = arith.constant 1.000000e+00 : f32
    %20 = vector.broadcast %cst_10 : f32 to vector<2x128xf32>
    %21 = arith.addf %20, %19 : vector<2x128xf32>
    %cst_11 = arith.constant 1.000000e+00 : f32
    %22 = vector.broadcast %cst_11 : f32 to vector<2x128xf32>
    %23 = arith.divf %22, %21 : vector<2x128xf32>
    %c0_12 = arith.constant 0 : index
    %c0_13 = arith.constant 0 : index
    %24 = vector.load %arg4[%c0_12, %c0_13] : memref<2x128xf32, #tpu.memory_space<vmem>>, vector<2x128xf32>
    tpu.vector_store %arg4[%c0_12, %c0_13], %23 {strides = array<i32>} : memref<2x128xf32, #tpu.memory_space<vmem>>, vector<2x128xf32>,
    return
  }
  func.func @transform_0(%arg0: i32) -> (i32, i32) {
    %c0_i32 = arith.constant 0 : i32
    %c0_i32_0 = arith.constant 0 : i32
    return %arg0, %c0_i32 : i32, i32
  }
  func.func @transform_1(%arg0: i32) -> (i32, i32) {
    %c0_i32 = arith.constant 0 : i32
    %c0_i32_0 = arith.constant 0 : i32
    %c0_i32_1 = arith.constant 0 : i32
    return %c0_i32, %c0_i32_0 : i32, i32
  }
  func.func @transform_2(%arg0: i32) -> (i32, i32) {
    %c0_i32 = arith.constant 0 : i32
    %c0_i32_0 = arith.constant 0 : i32
    %c0_i32_1 = arith.constant 0 : i32
    return %c0_i32, %c0_i32_0 : i32, i32
  }
  func.func @transform_3(%arg0: i32) -> (i32, i32) {
    %c0_i32 = arith.constant 0 : i32
    %c0_i32_0 = arith.constant 0 : i32
    return %arg0, %c0_i32 : i32, i32
  }
}

</mosaic_0001>

<bundles_post_ra>
// kernel: _lambda_.1
= control target key start
LH: loop header
LB: loop body
LE: loop exit
PB: predicated region body
PF: predicated region fallthrough
CT: control target
= control target key end

     0   :  { %v4662_v36 = vmov 1966171168   ;;  %v406_v38 = vlaneseq  ;;  %s6059_s0 = inlined_call_operand.vmem [shape: bf16[2,1024], index: 0, kind: input, shape index: {}]   ;;  %s6060_s1 = inlined_call_operand.vmem [shape: bf16[1024,768], index: 1, kind: input, shape index: {}]   ;;  %s6061_s2 = inlined_call_operand.vmem [shape: bf16[768,128], index: 2, kind: input, shape index: {}]   ;;  %s6062_s3 = inlined_call_operand.hbm [shape: f32[2,128], index: 3, kind: output, shape index: {}]  }
   0x1   :  { %v3985_v0 = vld [vmem:[%s6060_s1 + $0x4] ss:$24 sps:$4 sm:$0xff]   ;;  %v3989_v2 = vld [vmem:[%s6060_s1] ss:$24 sps:$4 sm:$0xff]   ;;  %v3991_v4 = vld [vmem:[%s6060_s1 + $0x34] ss:$24 sps:$4 sm:$0xff]   ;;  %v404_v37 = vunpack.c.l.s4 %v4662_v36 }
   0x2   :  { %v3987_v1 = vld [vmem:[%s6060_s1 + $0x304] ss:$24 sps:$4 sm:$0xff]   ;;  %2379 = vmatprep.subr.bf16.mxu1 %v3985_v0  ;;  %v3990_v3 = vld [vmem:[%s6060_s1 + $0x300] ss:$24 sps:$4 sm:$0xff]   ;;  %v3993_v5 = vld [vmem:[%s6060_s1 + $0x334] ss:$24 sps:$4 sm:$0xff]  }
   0x3   :  { %2420 = vmatprep.subr.bf16.mxu0 %v3987_v1  ;;  %2380 = vmatpush1.bf16.msra.mxu1 %v3989_v2  ;;  %v3995_v6 = vld [vmem:[%s6060_s1 + $0x30] ss:$24 sps:$4 sm:$0xff]   ;;  %v3997_v8 = vld [vmem:[%s6060_s1 + $0x64] ss:$24 sps:$4 sm:$0xff]   ;;  %v4001_v10 = vld [vmem:[%s6060_s1 + $0x60] ss:$24 sps:$4 sm:$0xff]   ;;  %v405_v42 = vunpack.c.0.s8 %v404_v37 }
   0x4   :  { %2421 = vmatpush1.bf16.msra.mxu0 %v3990_v3  ;;  %2381 = vmatprep.subr.bf16.mxu1 %v3991_v4  ;;  %v3996_v7 = vld [vmem:[%s6060_s1 + $0x330] ss:$24 sps:$4 sm:$0xff]   ;;  %v3999_v9 = vld [vmem:[%s6060_s1 + $0x364] ss:$24 sps:$4 sm:$0xff]   ;;  %v4002_v11 = vld [vmem:[%s6060_s1 + $0x360] ss:$24 sps:$4 sm:$0xff]  }
   0x5   :  { %2422 = vmatprep.subr.bf16.mxu0 %v3993_v5  ;;  %v4003_v12 = vld [vmem:[%s6060_s1 + $0x94] ss:$24 sps:$4 sm:$0xff]   ;;  %v4007_v14 = vld [vmem:[%s6060_s1 + $0x90] ss:$24 sps:$4 sm:$0xff]   ;;  %v4009_v16 = vld [vmem:[%s6060_s1 + $0xc4] ss:$24 sps:$4 sm:$0xff]  }
   0x6   :  { %v4005_v13 = vld [vmem:[%s6060_s1 + $0x394] ss:$24 sps:$4 sm:$0xff]   ;;  %v4008_v15 = vld [vmem:[%s6060_s1 + $0x390] ss:$24 sps:$4 sm:$0xff]   ;;  %v4011_v17 = vld [vmem:[%s6060_s1 + $0x3c4] ss:$24 sps:$4 sm:$0xff]  }
   0x7   :  { %2382 = vmatpush1.bf16.msra.mxu1 %v3995_v6  ;;  %v4013_v18 = vld [vmem:[%s6060_s1 + $0xc0] ss:$24 sps:$4 sm:$0xff]   ;;  %v4015_v20 = vld [vmem:[%s6060_s1 + $0xf4] ss:$24 sps:$4 sm:$0xff]   ;;  %v4019_v22 = vld [vmem:[%s6060_s1 + $0xf0] ss:$24 sps:$4 sm:$0xff]  }
   0x8   :  { %2423 = vmatpush1.bf16.msra.mxu0 %v3996_v7  ;;  %2383 = vmatprep.subr.bf16.mxu1 %v3997_v8  ;;  %v4014_v19 = vld [vmem:[%s6060_s1 + $0x3c0] ss:$24 sps:$4 sm:$0xff]   ;;  %v4017_v21 = vld [vmem:[%s6060_s1 + $0x3f4] ss:$24 sps:$4 sm:$0xff]   ;;  %v4020_v23 = vld [vmem:[%s6060_s1 + $0x3f0] ss:$24 sps:$4 sm:$0xff]  }
   0x9   :  { %2424 = vmatprep.subr.bf16.mxu0 %v3999_v9  ;;  %v4021_v24 = vld [vmem:[%s6060_s1 + $0x124] ss:$24 sps:$4 sm:$0xff]   ;;  %v4025_v26 = vld [vmem:[%s6060_s1 + $0x120] ss:$24 sps:$4 sm:$0xff]   ;;  %v4027_v28 = vld [vmem:[%s6060_s1 + $0x154] ss:$24 sps:$4 sm:$0xff]  }
   0xa   :  { %v4023_v25 = vld [vmem:[%s6060_s1 + $0x424] ss:$24 sps:$4 sm:$0xff]   ;;  %v4026_v27 = vld [vmem:[%s6060_s1 + $0x420] ss:$24 sps:$4 sm:$0xff]   ;;  %v4029_v29 = vld [vmem:[%s6060_s1 + $0x454] ss:$24 sps:$4 sm:$0xff]  }
   0xb   :  { %2384 = vmatpush1.bf16.msra.mxu1 %v4001_v10  ;;  %v4031_v30 = vld [vmem:[%s6060_s1 + $0x150] ss:$24 sps:$4 sm:$0xff]   ;;  %v4033_v32 = vld [vmem:[%s6060_s1 + $0x184] ss:$24 sps:$4 sm:$0xff]   ;;  %v4037_v34 = vld [vmem:[%s6060_s1 + $0x180] ss:$24 sps:$4 sm:$0xff]  }
   0xc   :  { %2425 = vmatpush1.bf16.msra.mxu0 %v4002_v11  ;;  %2385 = vmatprep.subr.bf16.mxu1 %v4003_v12  ;;  %v4032_v31 = vld [vmem:[%s6060_s1 + $0x450] ss:$24 sps:$4 sm:$0xff]   ;;  %v4035_v33 = vld [vmem:[%s6060_s1 + $0x484] ss:$24 sps:$4 sm:$0xff]   ;;  %v4038_v35 = vld [vmem:[%s6060_s1 + $0x480] ss:$24 sps:$4 sm:$0xff]  }
   0xd   :  { %2426 = vmatprep.subr.bf16.mxu0 %v4005_v13  ;;  %v4039_v39 = vld [vmem:[%s6060_s1 + $0x1b4] ss:$24 sps:$4 sm:$0xff]   ;;  %v4043_v41 = vld [vmem:[%s6060_s1 + $0x1b0] ss:$24 sps:$4 sm:$0xff]   ;;  %v407_v43 = vshrl.u32 %v406_v38, 7  ;;  %v16_v52 = vld [vmem:[%s6059_s0] sm:$0xff] }
   0xe   :  { %v4041_v40 = vld [vmem:[%s6060_s1 + $0x4b4] ss:$24 sps:$4 sm:$0xff]   ;;  %v4044_v44 = vld [vmem:[%s6060_s1 + $0x4b0] ss:$24 sps:$4 sm:$0xff]   ;;  %v4045_v45 = vld [vmem:[%s6060_s1 + $0x1e4] ss:$24 sps:$4 sm:$0xff]   ;;  %v402_v55 = vcombine.high %v16_v52, %v16_v52 }
   0xf   :  { %2386 = vmatpush1.bf16.msra.mxu1 %v4007_v14  ;;  %v4047_v46 = vld [vmem:[%s6060_s1 + $0x4e4] ss:$24 sps:$4 sm:$0xff]   ;;  %v4049_v47 = vld [vmem:[%s6060_s1 + $0x1e0] ss:$24 sps:$4 sm:$0xff]   ;;  %v4817_v49 = vsub.s32 %v405_v42, %v407_v43  ;;  %v4051_v50 = vld [vmem:[%s6060_s1 + $0x214] ss:$24 sps:$4 sm:$0xff]  }
  0x10   :  { %2427 = vmatpush1.bf16.msra.mxu0 %v4008_v15  ;;  %2387 = vmatprep.subr.bf16.mxu1 %v4009_v16  ;;  %v4050_v48 = vld [vmem:[%s6060_s1 + $0x4e0] ss:$24 sps:$4 sm:$0xff]   ;;  %v4053_v51 = vld [vmem:[%s6060_s1 + $0x514] ss:$24 sps:$4 sm:$0xff]   ;;  %v4055_v53 = vld [vmem:[%s6060_s1 + $0x210] ss:$24 sps:$4 sm:$0xff]  }
  0x11   :  { %2428 = vmatprep.subr.bf16.mxu0 %v4011_v17  ;;  %v409_v54 = vrot.slane %v16_v52, %v4817_v49  ;;  %v4056_v56 = vld [vmem:[%s6060_s1 + $0x510] ss:$24 sps:$4 sm:$0xff]   ;;  %v4057_v57 = vld [vmem:[%s6060_s1 + $0x244] ss:$24 sps:$4 sm:$0xff]   ;;  %v416_v60 = vrot.slane %v402_v55, %v4817_v49  ;;  %v4061_v61 = vld [vmem:[%s6060_s1 + $0x240] ss:$24 sps:$4 sm:$0xff]  }
  0x12   :  { %v4059_v58 = vld [vmem:[%s6060_s1 + $0x544] ss:$24 sps:$4 sm:$0xff]   ;;  %v4062_v0 = vld [vmem:[%s6060_s1 + $0x540] ss:$24 sps:$4 sm:$0xff]   ;;  %v4063_v1 = vld [vmem:[%s6060_s1 + $0x274] ss:$24 sps:$4 sm:$0xff]  }
  0x13   :  { %2388 = vmatpush1.bf16.msra.mxu1 %v4013_v18  ;;  %v417_v59 = vcombine.high %v409_v54, %v409_v54  ;;  %v4849_v63 = vrot.slane %v416_v60, %v4817_v49  ;;  %v4065_v2 = vld [vmem:[%s6060_s1 + $0x574] ss:$24 sps:$4 sm:$0xff]   ;;  %v4067_v4 = vld [vmem:[%s6060_s1 + $0x270] ss:$24 sps:$4 sm:$0xff]   ;;  %v4069_v6 = vld [vmem:[%s6060_s1 + $0x2a4] ss:$24 sps:$4 sm:$0xff]   ;;  %v4894_v13 = vrot.slane %v409_v54, %v4817_v49  ;;  %v418_v17 = vcombine.high %v416_v60, %v416_v60 }
  0x14   :  { %2429 = vmatpush1.bf16.msra.mxu0 %v4014_v19  ;;  %2389 = vmatprep.subr.bf16.mxu1 %v4015_v20  ;;  %v4068_v5 = vld [vmem:[%s6060_s1 + $0x570] ss:$24 sps:$4 sm:$0xff]   ;;  %v4071_v7 = vld [vmem:[%s6060_s1 + $0x5a4] ss:$24 sps:$4 sm:$0xff]   ;;  %v4073_v8 = vld [vmem:[%s6060_s1 + $0x2a0] ss:$24 sps:$4 sm:$0xff]  }
  0x15   :  { %2430 = vmatprep.subr.bf16.mxu0 %v4017_v21  ;;  %v4846_v62 = vrot.slane %v417_v59, %v4817_v49  ;;  %v4074_v9 = vld [vmem:[%s6060_s1 + $0x5a0] ss:$24 sps:$4 sm:$0xff]   ;;  %v4075_v10 = vld [vmem:[%s6060_s1 + $0x2d4] ss:$24 sps:$4 sm:$0xff]   ;;  %v4079_v12 = vld [vmem:[%s6060_s1 + $0x2d0] ss:$24 sps:$4 sm:$0xff]   ;;  %v4910_v19 = vcombine.high %v4894_v13, %v4894_v13 }
  0x16   :  { %v4077_v11 = vld [vmem:[%s6060_s1 + $0x5d4] ss:$24 sps:$4 sm:$0xff]   ;;  %v4080_v14 = vld [vmem:[%s6060_s1 + $0x5d0] ss:$24 sps:$4 sm:$0xff]   ;;  %v4083_v15 = vld [vmem:[%s6060_s1 + $0x604] ss:$24 sps:$4 sm:$0xff]  }
  0x17   :  { %2390 = vmatpush1.bf16.msra.mxu1 %v4019_v22  ;;  %v4862_v3 = vcombine.high %v4846_v62, %v4846_v62  ;;  %2411 = vmatprep.mubr.bf16.mxu1 %v4846_v62  ;;  %v4086_v16 = vld [vmem:[%s6060_s1 + $0xc] ss:$24 sps:$4 sm:$0xff]   ;;  %v4081_v18 = vld [vmem:[%s6060_s1 + $0x600] ss:$24 sps:$4 sm:$0xff]   ;;  %v4092_v22 = vld [vmem:[%s6060_s1 + $0x3c] ss:$24 sps:$4 sm:$0xff]  }
  0x18   :  { %2431 = vmatpush1.bf16.msra.mxu0 %v4020_v23  ;;  %2391 = vmatprep.subr.bf16.mxu1 %v4021_v24  ;;  %v4084_v20 = vld [vmem:[%s6060_s1 + $0x8] ss:$24 sps:$4 sm:$0xff]   ;;  %v4089_v21 = vld [vmem:[%s6060_s1 + $0x634] ss:$24 sps:$4 sm:$0xff]   ;;  %v4922_v23 = vrot.slane %v418_v17, %v4817_v49  ;;  %v4114_v42 = vld [vmem:[%s6060_s1 + $0xf8] ss:$24 sps:$4 sm:$0xff]  }
  0x19   :  { %2432 = vmatprep.subr.bf16.mxu0 %v4023_v25  ;;  %2452 = vmatprep.mubr.bf16.mxu0 %v4862_v3  ;;  %v4087_v24 = vld [vmem:[%s6060_s1 + $0x630] ss:$24 sps:$4 sm:$0xff]   ;;  %v4105_v36 = vld [vmem:[%s6060_s1 + $0x6c0] ss:$24 sps:$4 sm:$0xff]   ;;  %v4119_v43 = vld [vmem:[%s6060_s1 + $0x724] ss:$24 sps:$4 sm:$0xff]  }
  0x1a   :  { %v4090_v25 = vld [vmem:[%s6060_s1 + $0x38] ss:$24 sps:$4 sm:$0xff]   ;;  %v4108_v37 = vld [vmem:[%s6060_s1 + $0xc8] ss:$24 sps:$4 sm:$0xff]   ;;  %v4134_v52 = vld [vmem:[%s6060_s1 + $0x18c] ss:$24 sps:$4 sm:$0xff]  }
  0x1b   :  { %2392 = vmatpush1.bf16.msra.mxu1 %v4025_v26  ;;  %v4095_v26 = vld [vmem:[%s6060_s1 + $0x664] ss:$24 sps:$4 sm:$0xff]   ;;  %v4123_v49 = vld [vmem:[%s6060_s1 + $0x750] ss:$24 sps:$4 sm:$0xff]   ;;  %v4137_v55 = vld [vmem:[%s6060_s1 + $0x7b4] ss:$24 sps:$4 sm:$0xff]  }
  0x1c   :  { %2433 = vmatpush1.bf16.msra.mxu0 %v4026_v27  ;;  %2393 = vmatprep.subr.bf16.mxu1 %v4027_v28  ;;  %v4098_v27 = vld [vmem:[%s6060_s1 + $0x6c] ss:$24 sps:$4 sm:$0xff]   ;;  %v4093_v28 = vld [vmem:[%s6060_s1 + $0x660] ss:$24 sps:$4 sm:$0xff]  }
  0x1d   :  { %2434 = vmatprep.subr.bf16.mxu0 %v4029_v29  ;;  %v4096_v29 = vld [vmem:[%s6060_s1 + $0x68] ss:$24 sps:$4 sm:$0xff]   ;;  %v4143_v59 = vld [vmem:[%s6060_s1 + $0x7e4] ss:$24 sps:$4 sm:$0xff]  }
  0x1e   :  { %v4132_v54 = vld [vmem:[%s6060_s1 + $0x188] ss:$24 sps:$4 sm:$0xff]   ;;  %v4146_v60 = vld [vmem:[%s6060_s1 + $0x1ec] ss:$24 sps:$4 sm:$0xff]  }
  0x1f   :  { %2394 = vmatpush1.bf16.msra.mxu1 %v4031_v30  ;;  %v4101_v30 = vld [vmem:[%s6060_s1 + $0x694] ss:$24 sps:$4 sm:$0xff]   ;;  %v4165_v17 = vld [vmem:[%s6060_s1 + $0x8a0] ss:$24 sps:$4 sm:$0xff]  }
  0x20   :  { %2435 = vmatpush1.bf16.msra.mxu0 %v4032_v31  ;;  %2395 = vmatprep.subr.bf16.mxu1 %v4033_v32  ;;  %v4104_v31 = vld [vmem:[%s6060_s1 + $0x9c] ss:$24 sps:$4 sm:$0xff]   ;;  %v4099_v32 = vld [vmem:[%s6060_s1 + $0x690] ss:$24 sps:$4 sm:$0xff]  }
  0x21   :  { %2436 = vmatprep.subr.bf16.mxu0 %v4035_v33  ;;  %v4102_v33 = vld [vmem:[%s6060_s1 + $0x98] ss:$24 sps:$4 sm:$0xff]  }
  0x23   :  { %2396 = vmatpush1.bf16.msra.mxu1 %v4037_v34  ;;  %v4107_v34 = vld [vmem:[%s6060_s1 + $0x6c4] ss:$24 sps:$4 sm:$0xff]  }
  0x24   :  { %2437 = vmatpush1.bf16.msra.mxu0 %v4038_v35  ;;  %2397 = vmatprep.subr.bf16.mxu1 %v4039_v39  ;;  %v4110_v35 = vld [vmem:[%s6060_s1 + $0xcc] ss:$24 sps:$4 sm:$0xff]  }
  0x25   :  { %2438 = vmatprep.subr.bf16.mxu0 %v4041_v40  ;;  %v4113_v39 = vld [vmem:[%s6060_s1 + $0x6f4] ss:$24 sps:$4 sm:$0xff]  }
  0x26   :  { %v4116_v40 = vld [vmem:[%s6060_s1 + $0xfc] ss:$24 sps:$4 sm:$0xff]  }
  0x27   :  { %2398 = vmatpush1.bf16.msra.mxu1 %v4043_v41  ;;  %v4111_v41 = vld [vmem:[%s6060_s1 + $0x6f0] ss:$24 sps:$4 sm:$0xff]  }
  0x28   :  { %2439 = vmatpush1.bf16.msra.mxu0 %v4044_v44  ;;  %2399 = vmatprep.subr.bf16.mxu1 %v4045_v45  ;;  %v4122_v44 = vld [vmem:[%s6060_s1 + $0x12c] ss:$24 sps:$4 sm:$0xff]   ;;  %v4117_v45 = vld [vmem:[%s6060_s1 + $0x720] ss:$24 sps:$4 sm:$0xff]  }
  0x29   :  { %2440 = vmatprep.subr.bf16.mxu0 %v4047_v46  ;;  %v4120_v46 = vld [vmem:[%s6060_s1 + $0x128] ss:$24 sps:$4 sm:$0xff]  }
  0x2b   :  { %2400 = vmatpush1.bf16.msra.mxu1 %v4049_v47  ;;  %v4125_v47 = vld [vmem:[%s6060_s1 + $0x754] ss:$24 sps:$4 sm:$0xff]  }
  0x2c   :  { %2441 = vmatpush1.bf16.msra.mxu0 %v4050_v48  ;;  %2401 = vmatprep.subr.bf16.mxu1 %v4051_v50  ;;  %v4128_v48 = vld [vmem:[%s6060_s1 + $0x15c] ss:$24 sps:$4 sm:$0xff]   ;;  %v4126_v50 = vld [vmem:[%s6060_s1 + $0x158] ss:$24 sps:$4 sm:$0xff]  }
  0x2d   :  { %2442 = vmatprep.subr.bf16.mxu0 %v4053_v51  ;;  %v4131_v51 = vld [vmem:[%s6060_s1 + $0x784] ss:$24 sps:$4 sm:$0xff]  }
  0x2f   :  { %2402 = vmatpush1.bf16.msra.mxu1 %v4055_v53  ;;  %v4129_v53 = vld [vmem:[%s6060_s1 + $0x780] ss:$24 sps:$4 sm:$0xff]  }
  0x30   :  { %2443 = vmatpush1.bf16.msra.mxu0 %v4056_v56  ;;  %2403 = vmatprep.subr.bf16.mxu1 %v4057_v57  ;;  %v4140_v56 = vld [vmem:[%s6060_s1 + $0x1bc] ss:$24 sps:$4 sm:$0xff]   ;;  %v4135_v57 = vld [vmem:[%s6060_s1 + $0x7b0] ss:$24 sps:$4 sm:$0xff]  }
  0x31   :  { %2444 = vmatprep.subr.bf16.mxu0 %v4059_v58  ;;  %v4138_v58 = vld [vmem:[%s6060_s1 + $0x1b8] ss:$24 sps:$4 sm:$0xff]  }
  0x33   :  { %2404 = vmatpush1.bf16.msra.mxu1 %v4061_v61  ;;  %v4141_v61 = vld [vmem:[%s6060_s1 + $0x7e0] ss:$24 sps:$4 sm:$0xff]  }
  0x34   :  { %2445 = vmatpush1.bf16.msra.mxu0 %v4062_v0  ;;  %2405 = vmatprep.subr.bf16.mxu1 %v4063_v1  ;;  %v4144_v0 = vld [vmem:[%s6060_s1 + $0x1e8] ss:$24 sps:$4 sm:$0xff]   ;;  %v4149_v1 = vld [vmem:[%s6060_s1 + $0x814] ss:$24 sps:$4 sm:$0xff]  }
  0x35   :  { %2446 = vmatprep.subr.bf16.mxu0 %v4065_v2  ;;  %v4152_v2 = vld [vmem:[%s6060_s1 + $0x21c] ss:$24 sps:$4 sm:$0xff]  }
  0x37   :  { %2406 = vmatpush1.bf16.msra.mxu1 %v4067_v4  ;;  %v4147_v4 = vld [vmem:[%s6060_s1 + $0x810] ss:$24 sps:$4 sm:$0xff]  }
  0x38   :  { %2447 = vmatpush1.bf16.msra.mxu0 %v4068_v5  ;;  %2407 = vmatprep.subr.bf16.mxu1 %v4069_v6  ;;  %v4150_v5 = vld [vmem:[%s6060_s1 + $0x218] ss:$24 sps:$4 sm:$0xff]   ;;  %v4155_v6 = vld [vmem:[%s6060_s1 + $0x844] ss:$24 sps:$4 sm:$0xff]  }
  0x39   :  { %2448 = vmatprep.subr.bf16.mxu0 %v4071_v7  ;;  %v4158_v7 = vld [vmem:[%s6060_s1 + $0x24c] ss:$24 sps:$4 sm:$0xff]  }
  0x3b   :  { %2408 = vmatpush1.bf16.msra.mxu1 %v4073_v8  ;;  %v4153_v8 = vld [vmem:[%s6060_s1 + $0x840] ss:$24 sps:$4 sm:$0xff]  }
  0x3c   :  { %2449 = vmatpush1.bf16.msra.mxu0 %v4074_v9  ;;  %2409 = vmatprep.subr.bf16.mxu1 %v4075_v10  ;;  %v4156_v9 = vld [vmem:[%s6060_s1 + $0x248] ss:$24 sps:$4 sm:$0xff]   ;;  %v4161_v10 = vld [vmem:[%s6060_s1 + $0x874] ss:$24 sps:$4 sm:$0xff]  }
  0x3d   :  { %2450 = vmatprep.subr.bf16.mxu0 %v4077_v11  ;;  %v4164_v11 = vld [vmem:[%s6060_s1 + $0x27c] ss:$24 sps:$4 sm:$0xff]  }
  0x3f   :  { %2410 = vmatpush1.bf16.msra.mxu1 %v4079_v12  ;;  %v4159_v12 = vld [vmem:[%s6060_s1 + $0x870] ss:$24 sps:$4 sm:$0xff]  }
  0x40   :  { %2451 = vmatpush1.bf16.msra.mxu0 %v4080_v14  ;;  %2543 = vmatprep.subr.bf16.mxu1 %v4086_v16  ;;  %v4162_v14 = vld [vmem:[%s6060_s1 + $0x278] ss:$24 sps:$4 sm:$0xff]   ;;  %v4170_v16 = vld [vmem:[%s6060_s1 + $0x2ac] ss:$24 sps:$4 sm:$0xff]  }
  0x41   :  { %2461 = vmatprep.subr.bf16.mxu0 %v4083_v15  ;;  %v4167_v15 = vld [vmem:[%s6060_s1 + $0x8a4] ss:$24 sps:$4 sm:$0xff]  }
  0x42   :  { %2412 = vmatmul.mubr.bf16.vlgmr.msra.gmra.mrb[0].mxu1 %v4894_v13 }
  0x43   :  { %2453 = vmatmul.mubr.bf16.vlgmr.msra.gmra.mrb[0].mxu0 %v4910_v19  ;;  %2544 = vmatpush1.bf16.msra.mxu1 %v4084_v20  ;;  %v4173_v20 = vld [vmem:[%s6060_s1 + $0x8d4] ss:$24 sps:$4 sm:$0xff]  }
  0x44   :  { %2462 = vmatpush1.bf16.msra.mxu0 %v4081_v18  ;;  %2545 = vmatprep.subr.bf16.mxu1 %v4092_v22  ;;  %v4168_v18 = vld [vmem:[%s6060_s1 + $0x2a8] ss:$24 sps:$4 sm:$0xff]  }
  0x45   :  { %2463 = vmatprep.subr.bf16.mxu0 %v4089_v21  ;;  %2493 = vmatprep.mubr.bf16.mxu0 %v4922_v23  ;;  %v4176_v21 = vld [vmem:[%s6060_s1 + $0x2dc] ss:$24 sps:$4 sm:$0xff]   ;;  %v4171_v22 = vld [vmem:[%s6060_s1 + $0x8d0] ss:$24 sps:$4 sm:$0xff]  }
  0x46   :  { %2575 = vmatprep.mubr.bf16.mxu1 %v4846_v62 }
  0x47   :  { %2546 = vmatpush1.bf16.msra.mxu1 %v4090_v25  ;;  %v4180_v25 = vld [vmem:[%s6060_s1 + $0x904] ss:$24 sps:$4 sm:$0xff]  }
  0x48   :  { %2464 = vmatpush1.bf16.msra.mxu0 %v4087_v24  ;;  %2547 = vmatprep.subr.bf16.mxu1 %v4098_v27  ;;  %v4174_v24 = vld [vmem:[%s6060_s1 + $0x2d8] ss:$24 sps:$4 sm:$0xff]  }
  0x49   :  { %2465 = vmatprep.subr.bf16.mxu0 %v4095_v26  ;;  %v4183_v26 = vld [vmem:[%s6060_s1 + $0x30c] ss:$24 sps:$4 sm:$0xff]   ;;  %v4178_v27 = vld [vmem:[%s6060_s1 + $0x900] ss:$24 sps:$4 sm:$0xff]  }
  0x4b   :  { %2548 = vmatpush1.bf16.msra.mxu1 %v4096_v29  ;;  %v4186_v29 = vld [vmem:[%s6060_s1 + $0x934] ss:$24 sps:$4 sm:$0xff]  }
  0x4c   :  { %2466 = vmatpush1.bf16.msra.mxu0 %v4093_v28  ;;  %2549 = vmatprep.subr.bf16.mxu1 %v4104_v31  ;;  %v4181_v28 = vld [vmem:[%s6060_s1 + $0x308] ss:$24 sps:$4 sm:$0xff]   ;;  %v5122_v31 = vcombine.high %v4922_v23, %v4922_v23 }
  0x4d   :  { %2467 = vmatprep.subr.bf16.mxu0 %v4101_v30  ;;  %v4189_v30 = vld [vmem:[%s6060_s1 + $0x33c] ss:$24 sps:$4 sm:$0xff]  }
  0x4f   :  { %2550 = vmatpush1.bf16.msra.mxu1 %v4102_v33  ;;  %v4187_v33 = vld [vmem:[%s6060_s1 + $0x338] ss:$24 sps:$4 sm:$0xff]  }
  0x50   :  { %2468 = vmatpush1.bf16.msra.mxu0 %v4099_v32  ;;  %2551 = vmatprep.subr.bf16.mxu1 %v4110_v35  ;;  %v4184_v32 = vld [vmem:[%s6060_s1 + $0x930] ss:$24 sps:$4 sm:$0xff]   ;;  %v4195_v35 = vld [vmem:[%s6060_s1 + $0x36c] ss:$24 sps:$4 sm:$0xff]  }
  0x51   :  { %2469 = vmatprep.subr.bf16.mxu0 %v4107_v34  ;;  %v4192_v34 = vld [vmem:[%s6060_s1 + $0x964] ss:$24 sps:$4 sm:$0xff]  }
  0x53   :  { %2552 = vmatpush1.bf16.msra.mxu1 %v4108_v37  ;;  %v4193_v37 = vld [vmem:[%s6060_s1 + $0x368] ss:$24 sps:$4 sm:$0xff]  }
  0x54   :  { %2470 = vmatpush1.bf16.msra.mxu0 %v4105_v36  ;;  %2553 = vmatprep.subr.bf16.mxu1 %v4116_v40  ;;  %v4190_v36 = vld [vmem:[%s6060_s1 + $0x960] ss:$24 sps:$4 sm:$0xff]   ;;  %v4201_v40 = vld [vmem:[%s6060_s1 + $0x39c] ss:$24 sps:$4 sm:$0xff]  }
  0x55   :  { %2471 = vmatprep.subr.bf16.mxu0 %v4113_v39  ;;  %v4198_v39 = vld [vmem:[%s6060_s1 + $0x994] ss:$24 sps:$4 sm:$0xff]  }
  0x57   :  { %2554 = vmatpush1.bf16.msra.mxu1 %v4114_v42  ;;  %v4199_v42 = vld [vmem:[%s6060_s1 + $0x398] ss:$24 sps:$4 sm:$0xff]  }
  0x58   :  { %2472 = vmatpush1.bf16.msra.mxu0 %v4111_v41  ;;  %2555 = vmatprep.subr.bf16.mxu1 %v4122_v44  ;;  %v4196_v41 = vld [vmem:[%s6060_s1 + $0x990] ss:$24 sps:$4 sm:$0xff]   ;;  %v4207_v44 = vld [vmem:[%s6060_s1 + $0x3cc] ss:$24 sps:$4 sm:$0xff]  }
  0x59   :  { %2473 = vmatprep.subr.bf16.mxu0 %v4119_v43  ;;  %v4204_v43 = vld [vmem:[%s6060_s1 + $0x9c4] ss:$24 sps:$4 sm:$0xff]  }
  0x5b   :  { %2556 = vmatpush1.bf16.msra.mxu1 %v4120_v46  ;;  %v4205_v46 = vld [vmem:[%s6060_s1 + $0x3c8] ss:$24 sps:$4 sm:$0xff]  }
  0x5c   :  { %2474 = vmatpush1.bf16.msra.mxu0 %v4117_v45  ;;  %2557 = vmatprep.subr.bf16.mxu1 %v4128_v48  ;;  %v4202_v45 = vld [vmem:[%s6060_s1 + $0x9c0] ss:$24 sps:$4 sm:$0xff]   ;;  %v4213_v48 = vld [vmem:[%s6060_s1 + $0x3fc] ss:$24 sps:$4 sm:$0xff]  }
  0x5d   :  { %2475 = vmatprep.subr.bf16.mxu0 %v4125_v47  ;;  %v4210_v47 = vld [vmem:[%s6060_s1 + $0x9f4] ss:$24 sps:$4 sm:$0xff]  }
  0x5f   :  { %2558 = vmatpush1.bf16.msra.mxu1 %v4126_v50  ;;  %v4211_v50 = vld [vmem:[%s6060_s1 + $0x3f8] ss:$24 sps:$4 sm:$0xff]  }
  0x60   :  { %2476 = vmatpush1.bf16.msra.mxu0 %v4123_v49  ;;  %2559 = vmatprep.subr.bf16.mxu1 %v4134_v52  ;;  %v4208_v49 = vld [vmem:[%s6060_s1 + $0x9f0] ss:$24 sps:$4 sm:$0xff]   ;;  %v4219_v52 = vld [vmem:[%s6060_s1 + $0x42c] ss:$24 sps:$4 sm:$0xff]  }
  0x61   :  { %2477 = vmatprep.subr.bf16.mxu0 %v4131_v51  ;;  %v4216_v51 = vld [vmem:[%s6060_s1 + $0xa24] ss:$24 sps:$4 sm:$0xff]  }
  0x63   :  { %2560 = vmatpush1.bf16.msra.mxu1 %v4132_v54  ;;  %v4217_v54 = vld [vmem:[%s6060_s1 + $0x428] ss:$24 sps:$4 sm:$0xff]  }
  0x64   :  { %2478 = vmatpush1.bf16.msra.mxu0 %v4129_v53  ;;  %2561 = vmatprep.subr.bf16.mxu1 %v4140_v56  ;;  %v4214_v53 = vld [vmem:[%s6060_s1 + $0xa20] ss:$24 sps:$4 sm:$0xff]   ;;  %v4225_v56 = vld [vmem:[%s6060_s1 + $0x45c] ss:$24 sps:$4 sm:$0xff]  }
  0x65   :  { %2479 = vmatprep.subr.bf16.mxu0 %v4137_v55  ;;  %v4222_v55 = vld [vmem:[%s6060_s1 + $0xa54] ss:$24 sps:$4 sm:$0xff]  }
  0x67   :  { %2562 = vmatpush1.bf16.msra.mxu1 %v4138_v58  ;;  %v4223_v58 = vld [vmem:[%s6060_s1 + $0x458] ss:$24 sps:$4 sm:$0xff]  }
  0x68   :  { %2480 = vmatpush1.bf16.msra.mxu0 %v4135_v57  ;;  %2563 = vmatprep.subr.bf16.mxu1 %v4146_v60  ;;  %v4220_v57 = vld [vmem:[%s6060_s1 + $0xa50] ss:$24 sps:$4 sm:$0xff]   ;;  %v4231_v60 = vld [vmem:[%s6060_s1 + $0x48c] ss:$24 sps:$4 sm:$0xff]  }
  0x69   :  { %2481 = vmatprep.subr.bf16.mxu0 %v4143_v59  ;;  %v4228_v59 = vld [vmem:[%s6060_s1 + $0xa84] ss:$24 sps:$4 sm:$0xff]  }
  0x6b   :  { %2564 = vmatpush1.bf16.msra.mxu1 %v4144_v0  ;;  %v4229_v0 = vld [vmem:[%s6060_s1 + $0x488] ss:$24 sps:$4 sm:$0xff]  }
  0x6c   :  { %2482 = vmatpush1.bf16.msra.mxu0 %v4141_v61  ;;  %2565 = vmatprep.subr.bf16.mxu1 %v4152_v2  ;;  %v4226_v61 = vld [vmem:[%s6060_s1 + $0xa80] ss:$24 sps:$4 sm:$0xff]   ;;  %v4237_v2 = vld [vmem:[%s6060_s1 + $0x4bc] ss:$24 sps:$4 sm:$0xff]  }
  0x6d   :  { %2483 = vmatprep.subr.bf16.mxu0 %v4149_v1  ;;  %v4234_v1 = vld [vmem:[%s6060_s1 + $0xab4] ss:$24 sps:$4 sm:$0xff]  }
  0x6f   :  { %2566 = vmatpush1.bf16.msra.mxu1 %v4150_v5  ;;  %v4235_v5 = vld [vmem:[%s6060_s1 + $0x4b8] ss:$24 sps:$4 sm:$0xff]  }
  0x70   :  { %2484 = vmatpush1.bf16.msra.mxu0 %v4147_v4  ;;  %2567 = vmatprep.subr.bf16.mxu1 %v4158_v7  ;;  %v4232_v4 = vld [vmem:[%s6060_s1 + $0xab0] ss:$24 sps:$4 sm:$0xff]   ;;  %v4243_v7 = vld [vmem:[%s6060_s1 + $0x4ec] ss:$24 sps:$4 sm:$0xff]  }
  0x71   :  { %2485 = vmatprep.subr.bf16.mxu0 %v4155_v6  ;;  %v4240_v6 = vld [vmem:[%s6060_s1 + $0xae4] ss:$24 sps:$4 sm:$0xff]  }
  0x73   :  { %2568 = vmatpush1.bf16.msra.mxu1 %v4156_v9  ;;  %v4241_v9 = vld [vmem:[%s6060_s1 + $0x4e8] ss:$24 sps:$4 sm:$0xff]  }
  0x74   :  { %2486 = vmatpush1.bf16.msra.mxu0 %v4153_v8  ;;  %2569 = vmatprep.subr.bf16.mxu1 %v4164_v11  ;;  %v4238_v8 = vld [vmem:[%s6060_s1 + $0xae0] ss:$24 sps:$4 sm:$0xff]   ;;  %v4249_v11 = vld [vmem:[%s6060_s1 + $0x51c] ss:$24 sps:$4 sm:$0xff]  }
  0x75   :  { %2487 = vmatprep.subr.bf16.mxu0 %v4161_v10  ;;  %v4246_v10 = vld [vmem:[%s6060_s1 + $0xb14] ss:$24 sps:$4 sm:$0xff]  }
  0x77   :  { %2570 = vmatpush1.bf16.msra.mxu1 %v4162_v14  ;;  %v4247_v14 = vld [vmem:[%s6060_s1 + $0x518] ss:$24 sps:$4 sm:$0xff]  }
  0x78   :  { %2488 = vmatpush1.bf16.msra.mxu0 %v4159_v12  ;;  %2571 = vmatprep.subr.bf16.mxu1 %v4170_v16  ;;  %v4244_v12 = vld [vmem:[%s6060_s1 + $0xb10] ss:$24 sps:$4 sm:$0xff]   ;;  %v4255_v16 = vld [vmem:[%s6060_s1 + $0x54c] ss:$24 sps:$4 sm:$0xff]  }
  0x79   :  { %2489 = vmatprep.subr.bf16.mxu0 %v4167_v15  ;;  %v4252_v15 = vld [vmem:[%s6060_s1 + $0xb44] ss:$24 sps:$4 sm:$0xff]  }
  0x7b   :  { %2572 = vmatpush1.bf16.msra.mxu1 %v4168_v18  ;;  %v4253_v18 = vld [vmem:[%s6060_s1 + $0x548] ss:$24 sps:$4 sm:$0xff]  }
  0x7c   :  { %2490 = vmatpush1.bf16.msra.mxu0 %v4165_v17  ;;  %2573 = vmatprep.subr.bf16.mxu1 %v4176_v21  ;;  %v4250_v17 = vld [vmem:[%s6060_s1 + $0xb40] ss:$24 sps:$4 sm:$0xff]   ;;  %v4261_v21 = vld [vmem:[%s6060_s1 + $0x57c] ss:$24 sps:$4 sm:$0xff]  }
  0x7d   :  { %2491 = vmatprep.subr.bf16.mxu0 %v4173_v20  ;;  %v4258_v20 = vld [vmem:[%s6060_s1 + $0xb74] ss:$24 sps:$4 sm:$0xff]  }
  0x7f   :  { %2574 = vmatpush1.bf16.msra.mxu1 %v4174_v24  ;;  %v4259_v24 = vld [vmem:[%s6060_s1 + $0x578] ss:$24 sps:$4 sm:$0xff]  }
  0x80   :  { %2492 = vmatpush1.bf16.msra.mxu0 %v4171_v22  ;;  %2584 = vmatprep.subr.bf16.mxu1 %v4183_v26  ;;  %v4256_v22 = vld [vmem:[%s6060_s1 + $0xb70] ss:$24 sps:$4 sm:$0xff]   ;;  %v4267_v26 = vld [vmem:[%s6060_s1 + $0x5ac] ss:$24 sps:$4 sm:$0xff]  }
  0x81   :  { %2502 = vmatprep.subr.bf16.mxu0 %v4180_v25  ;;  %v4264_v25 = vld [vmem:[%s6060_s1 + $0xba4] ss:$24 sps:$4 sm:$0xff]  }
  0x82   :  { %2576 = vmatmul.mubr.bf16.vlgmr.msra.gmra.mrb[4].mxu1 %v4894_v13 }
  0x83   :  { %2494 = vmatmul.mubr.bf16.vlgmr.msra.gmra.mrb[0].mxu0 %v4849_v63  ;;  %2585 = vmatpush1.bf16.msra.mxu1 %v4181_v28  ;;  %v4265_v28 = vld [vmem:[%s6060_s1 + $0x5a8] ss:$24 sps:$4 sm:$0xff]  }
  0x84   :  { %2503 = vmatpush1.bf16.msra.mxu0 %v4178_v27  ;;  %2586 = vmatprep.subr.bf16.mxu1 %v4189_v30  ;;  %v4262_v27 = vld [vmem:[%s6060_s1 + $0xba0] ss:$24 sps:$4 sm:$0xff]   ;;  %v4273_v30 = vld [vmem:[%s6060_s1 + $0x5dc] ss:$24 sps:$4 sm:$0xff]  }
  0x85   :  { %2504 = vmatprep.subr.bf16.mxu0 %v4186_v29  ;;  %2534 = vmatprep.mubr.bf16.mxu0 %v5122_v31  ;;  %v4270_v29 = vld [vmem:[%s6060_s1 + $0xbd4] ss:$24 sps:$4 sm:$0xff]  }
  0x86   :  { %2616 = vmatprep.mubr.bf16.mxu1 %v4862_v3 }
  0x87   :  { %2587 = vmatpush1.bf16.msra.mxu1 %v4187_v33  ;;  %v4271_v33 = vld [vmem:[%s6060_s1 + $0x5d8] ss:$24 sps:$4 sm:$0xff]  }
  0x88   :  { %2505 = vmatpush1.bf16.msra.mxu0 %v4184_v32  ;;  %2588 = vmatprep.subr.bf16.mxu1 %v4195_v35  ;;  %v4268_v32 = vld [vmem:[%s6060_s1 + $0xbd0] ss:$24 sps:$4 sm:$0xff]   ;;  %v4279_v35 = vld [vmem:[%s6060_s1 + $0x14] ss:$24 sps:$4 sm:$0xff]  }
  0x89   :  { %2506 = vmatprep.subr.bf16.mxu0 %v4192_v34  ;;  %v4276_v34 = vld [vmem:[%s6060_s1 + $0x60c] ss:$24 sps:$4 sm:$0xff]  }
  0x8b   :  { %2589 = vmatpush1.bf16.msra.mxu1 %v4193_v37  ;;  %v4274_v37 = vld [vmem:[%s6060_s1 + $0x608] ss:$24 sps:$4 sm:$0xff]  }
  0x8c   :  { %2507 = vmatpush1.bf16.msra.mxu0 %v4190_v36  ;;  %2590 = vmatprep.subr.bf16.mxu1 %v4201_v40  ;;  %v5310_v36 = vcombine.high %v4849_v63, %v4849_v63  ;;  %v4282_v40 = vld [vmem:[%s6060_s1 + $0x63c] ss:$24 sps:$4 sm:$0xff]  }
  0x8d   :  { %2508 = vmatprep.subr.bf16.mxu0 %v4198_v39  ;;  %v4277_v39 = vld [vmem:[%s6060_s1 + $0x10] ss:$24 sps:$4 sm:$0xff]  }
  0x8f   :  { %2591 = vmatpush1.bf16.msra.mxu1 %v4199_v42  ;;  %v4280_v42 = vld [vmem:[%s6060_s1 + $0x638] ss:$24 sps:$4 sm:$0xff]  }
  0x90   :  { %2509 = vmatpush1.bf16.msra.mxu0 %v4196_v41  ;;  %2592 = vmatprep.subr.bf16.mxu1 %v4207_v44  ;;  %v4285_v41 = vld [vmem:[%s6060_s1 + $0x44] ss:$24 sps:$4 sm:$0xff]  }
  0x91   :  { %2510 = vmatprep.subr.bf16.mxu0 %v4204_v43  ;;  %v4283_v43 = vld [vmem:[%s6060_s1 + $0x40] ss:$24 sps:$4 sm:$0xff]   ;;  %v4288_v44 = vld [vmem:[%s6060_s1 + $0x66c] ss:$24 sps:$4 sm:$0xff]  }
  0x93   :  { %2593 = vmatpush1.bf16.msra.mxu1 %v4205_v46  ;;  %v4286_v46 = vld [vmem:[%s6060_s1 + $0x668] ss:$24 sps:$4 sm:$0xff]  }
  0x94   :  { %2511 = vmatpush1.bf16.msra.mxu0 %v4202_v45  ;;  %2594 = vmatprep.subr.bf16.mxu1 %v4213_v48  ;;  %v4291_v45 = vld [vmem:[%s6060_s1 + $0x74] ss:$24 sps:$4 sm:$0xff]  }
  0x95   :  { %2512 = vmatprep.subr.bf16.mxu0 %v4210_v47  ;;  %v4289_v47 = vld [vmem:[%s6060_s1 + $0x70] ss:$24 sps:$4 sm:$0xff]   ;;  %v4294_v48 = vld [vmem:[%s6060_s1 + $0x69c] ss:$24 sps:$4 sm:$0xff]  }
  0x97   :  { %2595 = vmatpush1.bf16.msra.mxu1 %v4211_v50  ;;  %v4295_v50 = vld [vmem:[%s6060_s1 + $0xa0] ss:$24 sps:$4 sm:$0xff]  }
  0x98   :  { %2513 = vmatpush1.bf16.msra.mxu0 %v4208_v49  ;;  %2596 = vmatprep.subr.bf16.mxu1 %v4219_v52  ;;  %v4292_v49 = vld [vmem:[%s6060_s1 + $0x698] ss:$24 sps:$4 sm:$0xff]   ;;  %v4303_v52 = vld [vmem:[%s6060_s1 + $0xd4] ss:$24 sps:$4 sm:$0xff]  }
  0x99   :  { %2514 = vmatprep.subr.bf16.mxu0 %v4216_v51  ;;  %v4300_v51 = vld [vmem:[%s6060_s1 + $0x6cc] ss:$24 sps:$4 sm:$0xff]  }
  0x9b   :  { %2597 = vmatpush1.bf16.msra.mxu1 %v4217_v54  ;;  %v4301_v54 = vld [vmem:[%s6060_s1 + $0xd0] ss:$24 sps:$4 sm:$0xff]  }
  0x9c   :  { %2515 = vmatpush1.bf16.msra.mxu0 %v4214_v53  ;;  %2598 = vmatprep.subr.bf16.mxu1 %v4225_v56  ;;  %v4298_v53 = vld [vmem:[%s6060_s1 + $0x6c8] ss:$24 sps:$4 sm:$0xff]   ;;  %v4309_v56 = vld [vmem:[%s6060_s1 + $0x104] ss:$24 sps:$4 sm:$0xff]  }
  0x9d   :  { %2516 = vmatprep.subr.bf16.mxu0 %v4222_v55  ;;  %v4306_v55 = vld [vmem:[%s6060_s1 + $0x6fc] ss:$24 sps:$4 sm:$0xff]  }
  0x9f   :  { %2599 = vmatpush1.bf16.msra.mxu1 %v4223_v58  ;;  %v4307_v58 = vld [vmem:[%s6060_s1 + $0x100] ss:$24 sps:$4 sm:$0xff]  }
  0xa0   :  { %2517 = vmatpush1.bf16.msra.mxu0 %v4220_v57  ;;  %2600 = vmatprep.subr.bf16.mxu1 %v4231_v60  ;;  %v4304_v57 = vld [vmem:[%s6060_s1 + $0x6f8] ss:$24 sps:$4 sm:$0xff]   ;;  %v4315_v60 = vld [vmem:[%s6060_s1 + $0x134] ss:$24 sps:$4 sm:$0xff]  }
  0xa1   :  { %2518 = vmatprep.subr.bf16.mxu0 %v4228_v59  ;;  %v4312_v59 = vld [vmem:[%s6060_s1 + $0x72c] ss:$24 sps:$4 sm:$0xff]  }
  0xa3   :  { %2601 = vmatpush1.bf16.msra.mxu1 %v4229_v0  ;;  %v4313_v0 = vld [vmem:[%s6060_s1 + $0x130] ss:$24 sps:$4 sm:$0xff]  }
  0xa4   :  { %2519 = vmatpush1.bf16.msra.mxu0 %v4226_v61  ;;  %2602 = vmatprep.subr.bf16.mxu1 %v4237_v2  ;;  %v4310_v61 = vld [vmem:[%s6060_s1 + $0x728] ss:$24 sps:$4 sm:$0xff]   ;;  %v4321_v2 = vld [vmem:[%s6060_s1 + $0x164] ss:$24 sps:$4 sm:$0xff]  }
  0xa5   :  { %2520 = vmatprep.subr.bf16.mxu0 %v4234_v1  ;;  %v4318_v1 = vld [vmem:[%s6060_s1 + $0x75c] ss:$24 sps:$4 sm:$0xff]  }
  0xa7   :  { %2603 = vmatpush1.bf16.msra.mxu1 %v4235_v5  ;;  %v4319_v5 = vld [vmem:[%s6060_s1 + $0x160] ss:$24 sps:$4 sm:$0xff]  }
  0xa8   :  { %2521 = vmatpush1.bf16.msra.mxu0 %v4232_v4  ;;  %2604 = vmatprep.subr.bf16.mxu1 %v4243_v7  ;;  %v4316_v4 = vld [vmem:[%s6060_s1 + $0x758] ss:$24 sps:$4 sm:$0xff]   ;;  %v4327_v7 = vld [vmem:[%s6060_s1 + $0x194] ss:$24 sps:$4 sm:$0xff]  }
  0xa9   :  { %2522 = vmatprep.subr.bf16.mxu0 %v4240_v6  ;;  %v4324_v6 = vld [vmem:[%s6060_s1 + $0x78c] ss:$24 sps:$4 sm:$0xff]  }
  0xab   :  { %2605 = vmatpush1.bf16.msra.mxu1 %v4241_v9  ;;  %v4325_v9 = vld [vmem:[%s6060_s1 + $0x190] ss:$24 sps:$4 sm:$0xff]  }
  0xac   :  { %2523 = vmatpush1.bf16.msra.mxu0 %v4238_v8  ;;  %2606 = vmatprep.subr.bf16.mxu1 %v4249_v11  ;;  %v4322_v8 = vld [vmem:[%s6060_s1 + $0x788] ss:$24 sps:$4 sm:$0xff]   ;;  %v4333_v11 = vld [vmem:[%s6060_s1 + $0x1c4] ss:$24 sps:$4 sm:$0xff]  }
  0xad   :  { %2524 = vmatprep.subr.bf16.mxu0 %v4246_v10  ;;  %v4330_v10 = vld [vmem:[%s6060_s1 + $0x7bc] ss:$24 sps:$4 sm:$0xff]  }
  0xaf   :  { %2607 = vmatpush1.bf16.msra.mxu1 %v4247_v14  ;;  %v4331_v14 = vld [vmem:[%s6060_s1 + $0x1c0] ss:$24 sps:$4 sm:$0xff]  }
  0xb0   :  { %2525 = vmatpush1.bf16.msra.mxu0 %v4244_v12  ;;  %2608 = vmatprep.subr.bf16.mxu1 %v4255_v16  ;;  %v4328_v12 = vld [vmem:[%s6060_s1 + $0x7b8] ss:$24 sps:$4 sm:$0xff]   ;;  %v4339_v16 = vld [vmem:[%s6060_s1 + $0x1f4] ss:$24 sps:$4 sm:$0xff]  }
  0xb1   :  { %2526 = vmatprep.subr.bf16.mxu0 %v4252_v15  ;;  %v4336_v15 = vld [vmem:[%s6060_s1 + $0x7ec] ss:$24 sps:$4 sm:$0xff]  }
  0xb3   :  { %2609 = vmatpush1.bf16.msra.mxu1 %v4253_v18  ;;  %v4337_v18 = vld [vmem:[%s6060_s1 + $0x1f0] ss:$24 sps:$4 sm:$0xff]  }
  0xb4   :  { %2527 = vmatpush1.bf16.msra.mxu0 %v4250_v17  ;;  %2610 = vmatprep.subr.bf16.mxu1 %v4261_v21  ;;  %v4334_v17 = vld [vmem:[%s6060_s1 + $0x7e8] ss:$24 sps:$4 sm:$0xff]   ;;  %v4345_v21 = vld [vmem:[%s6060_s1 + $0x224] ss:$24 sps:$4 sm:$0xff]  }
  0xb5   :  { %2528 = vmatprep.subr.bf16.mxu0 %v4258_v20  ;;  %v4342_v20 = vld [vmem:[%s6060_s1 + $0x81c] ss:$24 sps:$4 sm:$0xff]  }
  0xb7   :  { %2611 = vmatpush1.bf16.msra.mxu1 %v4259_v24  ;;  %v4343_v24 = vld [vmem:[%s6060_s1 + $0x220] ss:$24 sps:$4 sm:$0xff]  }
  0xb8   :  { %2529 = vmatpush1.bf16.msra.mxu0 %v4256_v22  ;;  %2612 = vmatprep.subr.bf16.mxu1 %v4267_v26  ;;  %v4340_v22 = vld [vmem:[%s6060_s1 + $0x818] ss:$24 sps:$4 sm:$0xff]   ;;  %v4351_v26 = vld [vmem:[%s6060_s1 + $0x254] ss:$24 sps:$4 sm:$0xff]  }
  0xb9   :  { %2530 = vmatprep.subr.bf16.mxu0 %v4264_v25  ;;  %v4348_v25 = vld [vmem:[%s6060_s1 + $0x84c] ss:$24 sps:$4 sm:$0xff]  }
  0xbb   :  { %2613 = vmatpush1.bf16.msra.mxu1 %v4265_v28  ;;  %v4349_v28 = vld [vmem:[%s6060_s1 + $0x250] ss:$24 sps:$4 sm:$0xff]  }
  0xbc   :  { %2531 = vmatpush1.bf16.msra.mxu0 %v4262_v27  ;;  %2614 = vmatprep.subr.bf16.mxu1 %v4273_v30  ;;  %v4346_v27 = vld [vmem:[%s6060_s1 + $0x848] ss:$24 sps:$4 sm:$0xff]   ;;  %v4357_v30 = vld [vmem:[%s6060_s1 + $0x284] ss:$24 sps:$4 sm:$0xff]  }
  0xbd   :  { %2532 = vmatprep.subr.bf16.mxu0 %v4270_v29  ;;  %v4354_v29 = vld [vmem:[%s6060_s1 + $0x87c] ss:$24 sps:$4 sm:$0xff]  }
  0xbf   :  { %2615 = vmatpush1.bf16.msra.mxu1 %v4271_v33  ;;  %v4355_v33 = vld [vmem:[%s6060_s1 + $0x280] ss:$24 sps:$4 sm:$0xff]  }
  0xc0   :  { %2533 = vmatpush1.bf16.msra.mxu0 %v4268_v32  ;;  %2625 = vmatprep.subr.bf16.mxu1 %v4276_v34  ;;  %v4352_v32 = vld [vmem:[%s6060_s1 + $0x878] ss:$24 sps:$4 sm:$0xff]   ;;  %v4360_v34 = vld [vmem:[%s6060_s1 + $0x8ac] ss:$24 sps:$4 sm:$0xff]  }
  0xc1   :  { %2707 = vmatprep.subr.bf16.mxu0 %v4279_v35  ;;  %v4363_v35 = vld [vmem:[%s6060_s1 + $0x2b4] ss:$24 sps:$4 sm:$0xff]  }
  0xc2   :  { %2617 = vmatmul.mubr.bf16.vlgmr.msra.gmra.mrb[4].mxu1 %v4910_v19 }
  0xc3   :  { %2535 = vmatmul.mubr.bf16.vlgmr.msra.gmra.mrb[0].mxu0 %v5310_v36  ;;  %2626 = vmatpush1.bf16.msra.mxu1 %v4274_v37  ;;  %v4358_v37 = vld [vmem:[%s6060_s1 + $0x8a8] ss:$24 sps:$4 sm:$0xff]  }
  0xc4   :  { %2708 = vmatpush1.bf16.msra.mxu0 %v4277_v39  ;;  %2627 = vmatprep.subr.bf16.mxu1 %v4282_v40  ;;  %v4361_v39 = vld [vmem:[%s6060_s1 + $0x2b0] ss:$24 sps:$4 sm:$0xff]   ;;  %v4366_v40 = vld [vmem:[%s6060_s1 + $0x8dc] ss:$24 sps:$4 sm:$0xff]  }
  0xc5   :  { %2709 = vmatprep.subr.bf16.mxu0 %v4285_v41  ;;  %2657 = vmatprep.mubr.bf16.mxu1 %v4922_v23  ;;  %v4369_v41 = vld [vmem:[%s6060_s1 + $0x2e4] ss:$24 sps:$4 sm:$0xff]  }
  0xc6   :  { %2739 = vmatprep.mubr.bf16.mxu0 %v4846_v62  ;;  %v4297_v62 = vld [vmem:[%s6060_s1 + $0xa4] ss:$24 sps:$4 sm:$0xff]  }
  0xc7   :  { %2628 = vmatpush1.bf16.msra.mxu1 %v4280_v42  ;;  %v4364_v42 = vld [vmem:[%s6060_s1 + $0x8d8] ss:$24 sps:$4 sm:$0xff]  }
  0xc8   :  { %2710 = vmatpush1.bf16.msra.mxu0 %v4283_v43  ;;  %2629 = vmatprep.subr.bf16.mxu1 %v4288_v44  ;;  %v4367_v43 = vld [vmem:[%s6060_s1 + $0x2e0] ss:$24 sps:$4 sm:$0xff]   ;;  %v4372_v44 = vld [vmem:[%s6060_s1 + $0x90c] ss:$24 sps:$4 sm:$0xff]  }
  0xc9   :  { %2711 = vmatprep.subr.bf16.mxu0 %v4291_v45  ;;  %v4375_v45 = vld [vmem:[%s6060_s1 + $0x314] ss:$24 sps:$4 sm:$0xff]  }
  0xcb   :  { %2630 = vmatpush1.bf16.msra.mxu1 %v4286_v46  ;;  %v4370_v46 = vld [vmem:[%s6060_s1 + $0x908] ss:$24 sps:$4 sm:$0xff]  }
  0xcc   :  { %2712 = vmatpush1.bf16.msra.mxu0 %v4289_v47  ;;  %2631 = vmatprep.subr.bf16.mxu1 %v4294_v48  ;;  %v4373_v47 = vld [vmem:[%s6060_s1 + $0x310] ss:$24 sps:$4 sm:$0xff]   ;;  %v4378_v48 = vld [vmem:[%s6060_s1 + $0x93c] ss:$24 sps:$4 sm:$0xff]  }
  0xcd   :  { %2713 = vmatprep.subr.bf16.mxu0 %v4297_v62  ;;  %v4381_v62 = vld [vmem:[%s6060_s1 + $0x344] ss:$24 sps:$4 sm:$0xff]  }
  0xcf   :  { %2632 = vmatpush1.bf16.msra.mxu1 %v4292_v49  ;;  %v4376_v49 = vld [vmem:[%s6060_s1 + $0x938] ss:$24 sps:$4 sm:$0xff]  }
  0xd0   :  { %2714 = vmatpush1.bf16.msra.mxu0 %v4295_v50  ;;  %2633 = vmatprep.subr.bf16.mxu1 %v4300_v51  ;;  %v4379_v50 = vld [vmem:[%s6060_s1 + $0x340] ss:$24 sps:$4 sm:$0xff]   ;;  %v4384_v51 = vld [vmem:[%s6060_s1 + $0x96c] ss:$24 sps:$4 sm:$0xff]  }
  0xd1   :  { %2715 = vmatprep.subr.bf16.mxu0 %v4303_v52  ;;  %v4387_v52 = vld [vmem:[%s6060_s1 + $0x374] ss:$24 sps:$4 sm:$0xff]  }
  0xd3   :  { %2634 = vmatpush1.bf16.msra.mxu1 %v4298_v53  ;;  %v4382_v53 = vld [vmem:[%s6060_s1 + $0x968] ss:$24 sps:$4 sm:$0xff]  }
  0xd4   :  { %2716 = vmatpush1.bf16.msra.mxu0 %v4301_v54  ;;  %2635 = vmatprep.subr.bf16.mxu1 %v4306_v55  ;;  %v4390_v54 = vld [vmem:[%s6060_s1 + $0x99c] ss:$24 sps:$4 sm:$0xff]  }
  0xd5   :  { %2717 = vmatprep.subr.bf16.mxu0 %v4309_v56  ;;  %v4393_v55 = vld [vmem:[%s6060_s1 + $0x3a4] ss:$24 sps:$4 sm:$0xff]   ;;  %v4388_v56 = vld [vmem:[%s6060_s1 + $0x998] ss:$24 sps:$4 sm:$0xff]  }
  0xd7   :  { %2636 = vmatpush1.bf16.msra.mxu1 %v4304_v57  ;;  %v4396_v57 = vld [vmem:[%s6060_s1 + $0x9cc] ss:$24 sps:$4 sm:$0xff]  }
  0xd8   :  { %2718 = vmatpush1.bf16.msra.mxu0 %v4307_v58  ;;  %2637 = vmatprep.subr.bf16.mxu1 %v4312_v59  ;;  %v4399_v58 = vld [vmem:[%s6060_s1 + $0x3d4] ss:$24 sps:$4 sm:$0xff]   ;;  %v4394_v59 = vld [vmem:[%s6060_s1 + $0x9c8] ss:$24 sps:$4 sm:$0xff]  }
  0xd9   :  { %2719 = vmatprep.subr.bf16.mxu0 %v4315_v60  ;;  %v4397_v60 = vld [vmem:[%s6060_s1 + $0x3d0] ss:$24 sps:$4 sm:$0xff]  }
  0xdb   :  { %2638 = vmatpush1.bf16.msra.mxu1 %v4310_v61  ;;  %v4402_v61 = vld [vmem:[%s6060_s1 + $0x9fc] ss:$24 sps:$4 sm:$0xff]  }
  0xdc   :  { %2720 = vmatpush1.bf16.msra.mxu0 %v4313_v0  ;;  %2639 = vmatprep.subr.bf16.mxu1 %v4318_v1  ;;  %v4405_v0 = vld [vmem:[%s6060_s1 + $0x404] ss:$24 sps:$4 sm:$0xff]   ;;  %v4400_v1 = vld [vmem:[%s6060_s1 + $0x9f8] ss:$24 sps:$4 sm:$0xff]  }
  0xdd   :  { %2721 = vmatprep.subr.bf16.mxu0 %v4321_v2  ;;  %v4403_v2 = vld [vmem:[%s6060_s1 + $0x400] ss:$24 sps:$4 sm:$0xff]  }
  0xdf   :  { %2640 = vmatpush1.bf16.msra.mxu1 %v4316_v4  ;;  %v4408_v4 = vld [vmem:[%s6060_s1 + $0xa2c] ss:$24 sps:$4 sm:$0xff]  }
  0xe0   :  { %2722 = vmatpush1.bf16.msra.mxu0 %v4319_v5  ;;  %2641 = vmatprep.subr.bf16.mxu1 %v4324_v6  ;;  %v4411_v5 = vld [vmem:[%s6060_s1 + $0x434] ss:$24 sps:$4 sm:$0xff]   ;;  %v4406_v6 = vld [vmem:[%s6060_s1 + $0xa28] ss:$24 sps:$4 sm:$0xff]  }
  0xe1   :  { %2723 = vmatprep.subr.bf16.mxu0 %v4327_v7  ;;  %v4409_v7 = vld [vmem:[%s6060_s1 + $0x430] ss:$24 sps:$4 sm:$0xff]  }
  0xe3   :  { %2642 = vmatpush1.bf16.msra.mxu1 %v4322_v8 }
  0xe4   :  { %2724 = vmatpush1.bf16.msra.mxu0 %v4325_v9  ;;  %2643 = vmatprep.subr.bf16.mxu1 %v4330_v10  ;;  %v4414_v9 = vld [vmem:[%s6060_s1 + $0xa5c] ss:$24 sps:$4 sm:$0xff]  }
  0xe5   :  { %2725 = vmatprep.subr.bf16.mxu0 %v4333_v11 }
  0xe7   :  { %2644 = vmatpush1.bf16.msra.mxu1 %v4328_v12  ;;  %v4417_v12 = vld [vmem:[%s6060_s1 + $0x464] ss:$24 sps:$4 sm:$0xff]  }
  0xe8   :  { %2726 = vmatpush1.bf16.msra.mxu0 %v4331_v14  ;;  %2645 = vmatprep.subr.bf16.mxu1 %v4336_v15  ;;  %v4412_v15 = vld [vmem:[%s6060_s1 + $0xa58] ss:$24 sps:$4 sm:$0xff]  }
  0xe9   :  { %2727 = vmatprep.subr.bf16.mxu0 %v4339_v16  ;;  %v4415_v16 = vld [vmem:[%s6060_s1 + $0x460] ss:$24 sps:$4 sm:$0xff]  }
  0xeb   :  { %2646 = vmatpush1.bf16.msra.mxu1 %v4334_v17 }
  0xec   :  { %2728 = vmatpush1.bf16.msra.mxu0 %v4337_v18  ;;  %2647 = vmatprep.subr.bf16.mxu1 %v4342_v20 }
  0xed   :  { %2729 = vmatprep.subr.bf16.mxu0 %v4345_v21 }
  0xef   :  { %2648 = vmatpush1.bf16.msra.mxu1 %v4340_v22 }
  0xf0   :  { %2730 = vmatpush1.bf16.msra.mxu0 %v4343_v24  ;;  %2649 = vmatprep.subr.bf16.mxu1 %v4348_v25 }
  0xf1   :  { %2731 = vmatprep.subr.bf16.mxu0 %v4351_v26 }
  0xf3   :  { %2650 = vmatpush1.bf16.msra.mxu1 %v4346_v27 }
  0xf4   :  { %2732 = vmatpush1.bf16.msra.mxu0 %v4349_v28  ;;  %2651 = vmatprep.subr.bf16.mxu1 %v4354_v29 }
  0xf5   :  { %2733 = vmatprep.subr.bf16.mxu0 %v4357_v30 }
  0xf7   :  { %2652 = vmatpush1.bf16.msra.mxu1 %v4352_v32 }
  0xf8   :  { %2734 = vmatpush1.bf16.msra.mxu0 %v4355_v33  ;;  %2653 = vmatprep.subr.bf16.mxu1 %v4360_v34 }
  0xf9   :  { %2735 = vmatprep.subr.bf16.mxu0 %v4363_v35 }
  0xfb   :  { %2654 = vmatpush1.bf16.msra.mxu1 %v4358_v37 }
  0xfc   :  { %2736 = vmatpush1.bf16.msra.mxu0 %v4361_v39  ;;  %2655 = vmatprep.subr.bf16.mxu1 %v4366_v40 }
  0xfd   :  { %2737 = vmatprep.subr.bf16.mxu0 %v4369_v41 }
  0xff   :  { %2656 = vmatpush1.bf16.msra.mxu1 %v4364_v42 }
 0x100   :  { %2738 = vmatpush1.bf16.msra.mxu0 %v4367_v43  ;;  %2666 = vmatprep.subr.bf16.mxu1 %v4372_v44 }
 0x101   :  { %2748 = vmatprep.subr.bf16.mxu0 %v4375_v45 }
 0x102   :  { %2658 = vmatmul.mubr.bf16.vlgmr.msra.gmra.mrb[4].mxu1 %v4849_v63 }
 0x103   :  { %2740 = vmatmul.mubr.bf16.vlgmr.msra.gmra.mrb[4].mxu0 %v4894_v13  ;;  %2667 = vmatpush1.bf16.msra.mxu1 %v4370_v46  ;;  %v4385_v13 = vld [vmem:[%s6060_s1 + $0x370] ss:$24 sps:$4 sm:$0xff]  }
 0x104   :  { %2749 = vmatpush1.bf16.msra.mxu0 %v4373_v47  ;;  %2668 = vmatprep.subr.bf16.mxu1 %v4378_v48 }
 0x105   :  { %2750 = vmatprep.subr.bf16.mxu0 %v4381_v62  ;;  %2698 = vmatprep.mubr.bf16.mxu1 %v5122_v31 }
 0x106   :  { %2780 = vmatprep.mubr.bf16.mxu0 %v4862_v3  ;;  %v4391_v3 = vld [vmem:[%s6060_s1 + $0x3a0] ss:$24 sps:$4 sm:$0xff]  }
 0x107   :  { %2669 = vmatpush1.bf16.msra.mxu1 %v4376_v49 }
 0x108   :  { %2751 = vmatpush1.bf16.msra.mxu0 %v4379_v50  ;;  %2670 = vmatprep.subr.bf16.mxu1 %v4384_v51 }
 0x109   :  { %2752 = vmatprep.subr.bf16.mxu0 %v4387_v52 }
 0x10b   :  { %2671 = vmatpush1.bf16.msra.mxu1 %v4382_v53 }
 0x10c   :  { %2753 = vmatpush1.bf16.msra.mxu0 %v4385_v13  ;;  %2672 = vmatprep.subr.bf16.mxu1 %v4390_v54 }
 0x10d   :  { %2754 = vmatprep.subr.bf16.mxu0 %v4393_v55 }
 0x10f   :  { %2673 = vmatpush1.bf16.msra.mxu1 %v4388_v56 }
 0x110   :  { %2755 = vmatpush1.bf16.msra.mxu0 %v4391_v3  ;;  %2674 = vmatprep.subr.bf16.mxu1 %v4396_v57 }
 0x111   :  { %2756 = vmatprep.subr.bf16.mxu0 %v4399_v58 }
 0x113   :  { %2675 = vmatpush1.bf16.msra.mxu1 %v4394_v59 }
 0x114   :  { %2757 = vmatpush1.bf16.msra.mxu0 %v4397_v60  ;;  %2676 = vmatprep.subr.bf16.mxu1 %v4402_v61 }
 0x115   :  { %2758 = vmatprep.subr.bf16.mxu0 %v4405_v0  ;;  %v5590_v8 = vpop.f32.mrb[0].mxu1 }
 0x116   :  { %v5595_v10 = vpop.f32.mrb[1].mxu1 }
 0x117   :  { %2677 = vmatpush1.bf16.msra.mxu1 %v4400_v1  ;;  %v2417_v11 = vpop.f32.mrb[2].mxu1 }
 0x118   :  { %2759 = vmatpush1.bf16.msra.mxu0 %v4403_v2  ;;  %2678 = vmatprep.subr.bf16.mxu1 %v4408_v4  ;;  %v2418_v14 = vpop.f32.mrb[3].mxu1 }
 0x119   :  { %2760 = vmatprep.subr.bf16.mxu0 %v4411_v5 }
 0x11b   :  { %2679 = vmatpush1.bf16.msra.mxu1 %v4406_v6 }
 0x11c   :  { %2761 = vmatpush1.bf16.msra.mxu0 %v4409_v7 }
 0x11d   :  { %8 = vsyncpa [#allocation3], 0  ;;  %2680 = vmatprep.subr.bf16.mxu1 %v4414_v9  ;;  %2762 = vmatprep.subr.bf16.mxu0 %v4417_v12  ;;  %v4420_v17 = vld [vmem:[%s6060_s1 + $0xa8c] ss:$24 sps:$4 sm:$0xff]   ;;  %v4418_v20 = vld [vmem:[%s6060_s1 + $0xa88] ss:$24 sps:$4 sm:$0xff]  }
 0x11e   :  { %v4423_v18 = vld [vmem:[%s6060_s1 + $0x494] ss:$24 sps:$4 sm:$0xff]   ;;  %v4421_v21 = vld [vmem:[%s6060_s1 + $0x490] ss:$24 sps:$4 sm:$0xff]   ;;  %v4429_v24 = vld [vmem:[%s6060_s1 + $0x4c4] ss:$24 sps:$4 sm:$0xff]  }
 0x11f   :  { %2681 = vmatpush1.bf16.msra.mxu1 %v4412_v15  ;;  %v4426_v22 = vld [vmem:[%s6060_s1 + $0xabc] ss:$24 sps:$4 sm:$0xff]   ;;  %v4424_v25 = vld [vmem:[%s6060_s1 + $0xab8] ss:$24 sps:$4 sm:$0xff]   ;;  %v4432_v27 = vld [vmem:[%s6060_s1 + $0xaec] ss:$24 sps:$4 sm:$0xff]  }
 0x120   :  { %2763 = vmatpush1.bf16.msra.mxu0 %v4415_v16  ;;  %2682 = vmatprep.subr.bf16.mxu1 %v4420_v17  ;;  %v4427_v26 = vld [vmem:[%s6060_s1 + $0x4c0] ss:$24 sps:$4 sm:$0xff]   ;;  %v4435_v28 = vld [vmem:[%s6060_s1 + $0x4f4] ss:$24 sps:$4 sm:$0xff]   ;;  %v4433_v30 = vld [vmem:[%s6060_s1 + $0x4f0] ss:$24 sps:$4 sm:$0xff]  }
 0x121   :  { %2764 = vmatprep.subr.bf16.mxu0 %v4423_v18  ;;  %v4430_v29 = vld [vmem:[%s6060_s1 + $0xae8] ss:$24 sps:$4 sm:$0xff]   ;;  %v4438_v32 = vld [vmem:[%s6060_s1 + $0xb1c] ss:$24 sps:$4 sm:$0xff]   ;;  %v4436_v34 = vld [vmem:[%s6060_s1 + $0xb18] ss:$24 sps:$4 sm:$0xff]  }
 0x122   :  { %v4441_v33 = vld [vmem:[%s6060_s1 + $0x524] ss:$24 sps:$4 sm:$0xff]   ;;  %v4439_v35 = vld [vmem:[%s6060_s1 + $0x520] ss:$24 sps:$4 sm:$0xff]   ;;  %v4447_v39 = vld [vmem:[%s6060_s1 + $0x554] ss:$24 sps:$4 sm:$0xff]  }
 0x123   :  { %2683 = vmatpush1.bf16.msra.mxu1 %v4418_v20  ;;  %v4444_v37 = vld [vmem:[%s6060_s1 + $0xb4c] ss:$24 sps:$4 sm:$0xff]   ;;  %v4442_v40 = vld [vmem:[%s6060_s1 + $0xb48] ss:$24 sps:$4 sm:$0xff]   ;;  %v4450_v42 = vld [vmem:[%s6060_s1 + $0xb7c] ss:$24 sps:$4 sm:$0xff]  }
 0x124   :  { %2765 = vmatpush1.bf16.msra.mxu0 %v4421_v21  ;;  %2684 = vmatprep.subr.bf16.mxu1 %v4426_v22  ;;  %v4445_v41 = vld [vmem:[%s6060_s1 + $0x550] ss:$24 sps:$4 sm:$0xff]   ;;  %v4453_v43 = vld [vmem:[%s6060_s1 + $0x584] ss:$24 sps:$4 sm:$0xff]   ;;  %v4451_v45 = vld [vmem:[%s6060_s1 + $0x580] ss:$24 sps:$4 sm:$0xff]  }
 0x125   :  { %2766 = vmatprep.subr.bf16.mxu0 %v4429_v24  ;;  %v4448_v44 = vld [vmem:[%s6060_s1 + $0xb78] ss:$24 sps:$4 sm:$0xff]   ;;  %v4456_v46 = vld [vmem:[%s6060_s1 + $0xbac] ss:$24 sps:$4 sm:$0xff]   ;;  %v4454_v48 = vld [vmem:[%s6060_s1 + $0xba8] ss:$24 sps:$4 sm:$0xff]  }
 0x126   :  { %v4459_v47 = vld [vmem:[%s6060_s1 + $0x5b4] ss:$24 sps:$4 sm:$0xff]   ;;  %v4457_v62 = vld [vmem:[%s6060_s1 + $0x5b0] ss:$24 sps:$4 sm:$0xff]   ;;  %v4465_v50 = vld [vmem:[%s6060_s1 + $0x5e4] ss:$24 sps:$4 sm:$0xff]  }
 0x127   :  { %2685 = vmatpush1.bf16.msra.mxu1 %v4424_v25  ;;  %v4462_v49 = vld [vmem:[%s6060_s1 + $0xbdc] ss:$24 sps:$4 sm:$0xff]   ;;  %v4460_v51 = vld [vmem:[%s6060_s1 + $0xbd8] ss:$24 sps:$4 sm:$0xff]   ;;  %v4532_v13 = vld [vmem:[%s6061_s2 + $0x40] sm:$0xff]  }
 0x128   :  { %2767 = vmatpush1.bf16.msra.mxu0 %v4427_v26  ;;  %2686 = vmatprep.subr.bf16.mxu1 %v4432_v27  ;;  %v4463_v52 = vld [vmem:[%s6060_s1 + $0x5e0] ss:$24 sps:$4 sm:$0xff]   ;;  %v4468_v53 = vld [vmem:[%s6060_s1 + $0x614] ss:$24 sps:$4 sm:$0xff]   ;;  %v4466_v54 = vld [vmem:[%s6060_s1 + $0x610] ss:$24 sps:$4 sm:$0xff]  }
 0x129   :  { %2768 = vmatprep.subr.bf16.mxu0 %v4435_v28  ;;  %v4471_v55 = vld [vmem:[%s6060_s1 + $0x644] ss:$24 sps:$4 sm:$0xff]   ;;  %v4537_v3 = vld [vmem:[%s6061_s2 + $0x48] sm:$0xff]   ;;  %v4469_v57 = vld [vmem:[%s6060_s1 + $0x640] ss:$24 sps:$4 sm:$0xff]  }
 0x12a   :  { %v4533_v56 = vld [vmem:[%s6061_s2] sm:$0xff]   ;;  %v4474_v58 = vld [vmem:[%s6060_s1 + $0x674] ss:$24 sps:$4 sm:$0xff]   ;;  %v4547_v0 = vld [vmem:[%s6061_s2 + $0x58] sm:$0xff]  }
 0x12b   :  { %2687 = vmatpush1.bf16.msra.mxu1 %v4430_v29  ;;  %v4538_v59 = vld [vmem:[%s6061_s2 + $0x8] sm:$0xff]   ;;  %v4477_v60 = vld [vmem:[%s6060_s1 + $0x6a4] ss:$24 sps:$4 sm:$0xff]   ;;  %v4543_v61 = vld [vmem:[%s6061_s2 + $0x10] sm:$0xff]  }
 0x12c   :  { %2769 = vmatpush1.bf16.msra.mxu0 %v4433_v30  ;;  %2688 = vmatprep.subr.bf16.mxu1 %v4438_v32  ;;  %v4475_v1 = vld [vmem:[%s6060_s1 + $0x6a0] ss:$24 sps:$4 sm:$0xff]   ;;  %v4480_v2 = vld [vmem:[%s6060_s1 + $0x6d4] ss:$24 sps:$4 sm:$0xff]   ;;  %v4478_v6 = vld [vmem:[%s6060_s1 + $0x6d0] ss:$24 sps:$4 sm:$0xff]  }
 0x12d   :  { %2770 = vmatprep.subr.bf16.mxu0 %v4441_v33  ;;  %v4548_v4 = vld [vmem:[%s6061_s2 + $0x18] sm:$0xff]   ;;  %v4552_v5 = vld [vmem:[%s6061_s2 + $0x60] sm:$0xff]   ;;  %v4557_v11 = vld [vmem:[%s6061_s2 + $0x68] sm:$0xff]  }
 0x12e   :  { %v4483_v7 = vld [vmem:[%s6060_s1 + $0x704] ss:$24 sps:$4 sm:$0xff]   ;;  %v4481_v12 = vld [vmem:[%s6060_s1 + $0x700] ss:$24 sps:$4 sm:$0xff]   ;;  %v4486_v14 = vld [vmem:[%s6060_s1 + $0x734] ss:$24 sps:$4 sm:$0xff]  }
 0x12f   :  { %2689 = vmatpush1.bf16.msra.mxu1 %v4436_v34  ;;  %v4553_v9 = vld [vmem:[%s6061_s2 + $0x20] sm:$0xff]   ;;  %v4558_v15 = vld [vmem:[%s6061_s2 + $0x28] sm:$0xff]   ;;  %v4562_v16 = vld [vmem:[%s6061_s2 + $0x70] sm:$0xff]  }
 0x130   :  { %2771 = vmatpush1.bf16.msra.mxu0 %v4439_v35  ;;  %2690 = vmatprep.subr.bf16.mxu1 %v4444_v37  ;;  %v4484_v17 = vld [vmem:[%s6060_s1 + $0x730] ss:$24 sps:$4 sm:$0xff]   ;;  %v4489_v18 = vld [vmem:[%s6060_s1 + $0x764] ss:$24 sps:$4 sm:$0xff]   ;;  %v4487_v22 = vld [vmem:[%s6060_s1 + $0x760] ss:$24 sps:$4 sm:$0xff]  }
 0x131   :  { %2772 = vmatprep.subr.bf16.mxu0 %v4447_v39  ;;  %v4563_v20 = vld [vmem:[%s6061_s2 + $0x30] sm:$0xff]   ;;  %v4567_v21 = vld [vmem:[%s6061_s2 + $0x78] sm:$0xff]  }
 0x132   :  { %v4492_v24 = vld [vmem:[%s6060_s1 + $0x794] ss:$24 sps:$4 sm:$0xff]   ;;  %v4568_v25 = vld [vmem:[%s6061_s2 + $0x38] sm:$0xff]   ;;  %v4490_v26 = vld [vmem:[%s6060_s1 + $0x790] ss:$24 sps:$4 sm:$0xff]  }
 0x133   :  { %2691 = vmatpush1.bf16.msra.mxu1 %v4442_v40  ;;  %v4495_v27 = vld [vmem:[%s6060_s1 + $0x7c4] ss:$24 sps:$4 sm:$0xff]   ;;  %v4493_v28 = vld [vmem:[%s6060_s1 + $0x7c0] ss:$24 sps:$4 sm:$0xff]   ;;  %v4498_v29 = vld [vmem:[%s6060_s1 + $0x7f4] ss:$24 sps:$4 sm:$0xff]  }
 0x134   :  { %2773 = vmatpush1.bf16.msra.mxu0 %v4445_v41  ;;  %2692 = vmatprep.subr.bf16.mxu1 %v4450_v42  ;;  %v4496_v30 = vld [vmem:[%s6060_s1 + $0x7f0] ss:$24 sps:$4 sm:$0xff]   ;;  %v4501_v32 = vld [vmem:[%s6060_s1 + $0x824] ss:$24 sps:$4 sm:$0xff]   ;;  %v4499_v33 = vld [vmem:[%s6060_s1 + $0x820] ss:$24 sps:$4 sm:$0xff]  }
 0x135   :  { %2774 = vmatprep.subr.bf16.mxu0 %v4453_v43  ;;  %v4504_v34 = vld [vmem:[%s6060_s1 + $0x854] ss:$24 sps:$4 sm:$0xff]   ;;  %v4502_v35 = vld [vmem:[%s6060_s1 + $0x850] ss:$24 sps:$4 sm:$0xff]   ;;  %v4507_v37 = vld [vmem:[%s6060_s1 + $0x884] ss:$24 sps:$4 sm:$0xff]  }
 0x136   :  { %v4505_v39 = vld [vmem:[%s6060_s1 + $0x880] ss:$24 sps:$4 sm:$0xff]   ;;  %v4510_v40 = vld [vmem:[%s6060_s1 + $0x8b4] ss:$24 sps:$4 sm:$0xff]   ;;  %v4508_v41 = vld [vmem:[%s6060_s1 + $0x8b0] ss:$24 sps:$4 sm:$0xff]  }
 0x137   :  { %2693 = vmatpush1.bf16.msra.mxu1 %v4448_v44  ;;  %v4513_v42 = vld [vmem:[%s6060_s1 + $0x8e4] ss:$24 sps:$4 sm:$0xff]   ;;  %v4511_v43 = vld [vmem:[%s6060_s1 + $0x8e0] ss:$24 sps:$4 sm:$0xff]   ;;  %v4516_v44 = vld [vmem:[%s6060_s1 + $0x914] ss:$24 sps:$4 sm:$0xff]  }
 0x138   :  { %2775 = vmatpush1.bf16.msra.mxu0 %v4451_v45  ;;  %2694 = vmatprep.subr.bf16.mxu1 %v4456_v46  ;;  %v4514_v45 = vld [vmem:[%s6060_s1 + $0x910] ss:$24 sps:$4 sm:$0xff]   ;;  %v4519_v46 = vld [vmem:[%s6060_s1 + $0x944] ss:$24 sps:$4 sm:$0xff]  }
 0x139   :  { %2776 = vmatprep.subr.bf16.mxu0 %v4459_v47  ;;  %v4517_v47 = vld [vmem:[%s6060_s1 + $0x940] ss:$24 sps:$4 sm:$0xff]  }
 0x13b   :  { %2695 = vmatpush1.bf16.msra.mxu1 %v4454_v48  ;;  %v4522_v48 = vld [vmem:[%s6060_s1 + $0x974] ss:$24 sps:$4 sm:$0xff]  }
 0x13c   :  { %2777 = vmatpush1.bf16.msra.mxu0 %v4457_v62  ;;  %2696 = vmatprep.subr.bf16.mxu1 %v4462_v49  ;;  %v4520_v62 = vld [vmem:[%s6060_s1 + $0x970] ss:$24 sps:$4 sm:$0xff]   ;;  %v4528_v49 = vld [vmem:[%s6060_s1 + $0x9d4] ss:$24 sps:$4 sm:$0xff]  }
 0x13d   :  { %2778 = vmatprep.subr.bf16.mxu0 %v4465_v50  ;;  %v4526_v50 = vld [vmem:[%s6060_s1 + $0x9d0] ss:$24 sps:$4 sm:$0xff]  }
 0x13f   :  { %2697 = vmatpush1.bf16.msra.mxu1 %v4460_v51  ;;  %v4531_v51 = vld [vmem:[%s6060_s1 + $0xa04] ss:$24 sps:$4 sm:$0xff]  }
 0x140   :  { %2779 = vmatpush1.bf16.msra.mxu0 %v4463_v52  ;;  %3883 = vmatprep.subr.bf16.mxu1 %v4532_v13  ;;  %v4529_v52 = vld [vmem:[%s6060_s1 + $0xa00] ss:$24 sps:$4 sm:$0xff]  }
 0x141   :  { %2789 = vmatprep.subr.bf16.mxu0 %v4468_v53  ;;  %v4536_v53 = vld [vmem:[%s6060_s1 + $0xa34] ss:$24 sps:$4 sm:$0xff]   ;;  %v4578_v13 = vld [vmem:[%s6061_s2 + $0xc0] sm:$0xff]  }
 0x142   :  { %2699 = vmatmul.mubr.bf16.vlgmr.msra.gmra.mrb[4].mxu1 %v5310_v36 }
 0x143   :  { %2781 = vmatmul.mubr.bf16.vlgmr.msra.gmra.mrb[4].mxu0 %v4910_v19  ;;  %3884 = vmatpush3.bf16.msra.mxu1 %v4533_v56  ;;  %v4542_v19 = vld [vmem:[%s6061_s2 + $0x50] sm:$0xff]  }
 0x144   :  { %2790 = vmatpush1.bf16.msra.mxu0 %v4466_v54  ;;  %2821 = vmatprep.mubr.bf16.mxu0 %v4922_v23  ;;  %v4472_v23 = vld [vmem:[%s6060_s1 + $0x670] ss:$24 sps:$4 sm:$0xff]  }
 0x145   :  { %2791 = vmatprep.subr.bf16.mxu0 %v4471_v55  ;;  %3885 = vmatprep.subr.bf16.mxu1 %v4537_v3 }
 0x147   :  { %3886 = vmatpush3.bf16.msra.mxu1 %v4538_v59 }
 0x148   :  { %2792 = vmatpush1.bf16.msra.mxu0 %v4469_v57  ;;  %3887 = vmatprep.subr.bf16.mxu1 %v4542_v19 }
 0x149   :  { %2793 = vmatprep.subr.bf16.mxu0 %v4474_v58  ;;  %v4534_v58 = vld [vmem:[%s6060_s1 + $0xa30] ss:$24 sps:$4 sm:$0xff]  }
 0x14b   :  { %3888 = vmatpush3.bf16.msra.mxu1 %v4543_v61 }
 0x14c   :  { %2794 = vmatpush1.bf16.msra.mxu0 %v4472_v23  ;;  %3889 = vmatprep.subr.bf16.mxu1 %v4547_v0  ;;  %v4541_v23 = vld [vmem:[%s6060_s1 + $0xa64] ss:$24 sps:$4 sm:$0xff]   ;;  %v4546_v0 = vld [vmem:[%s6060_s1 + $0xa94] ss:$24 sps:$4 sm:$0xff]  }
 0x14d   :  { %2795 = vmatprep.subr.bf16.mxu0 %v4477_v60 }
 0x14f   :  { %3890 = vmatpush3.bf16.msra.mxu1 %v4548_v4  ;;  %v4549_v4 = vld [vmem:[%s6060_s1 + $0xac0] ss:$24 sps:$4 sm:$0xff]  }
 0x150   :  { %2796 = vmatpush1.bf16.msra.mxu0 %v4475_v1  ;;  %3891 = vmatprep.subr.bf16.mxu1 %v4552_v5  ;;  %v4544_v1 = vld [vmem:[%s6060_s1 + $0xa90] ss:$24 sps:$4 sm:$0xff]   ;;  %v4556_v5 = vld [vmem:[%s6060_s1 + $0xaf4] ss:$24 sps:$4 sm:$0xff]  }
 0x151   :  { %2797 = vmatprep.subr.bf16.mxu0 %v4480_v2  ;;  %v4551_v2 = vld [vmem:[%s6060_s1 + $0xac4] ss:$24 sps:$4 sm:$0xff]  }
 0x153   :  { %3892 = vmatpush3.bf16.msra.mxu1 %v4553_v9 }
 0x154   :  { %2798 = vmatpush1.bf16.msra.mxu0 %v4478_v6  ;;  %3893 = vmatprep.subr.bf16.mxu1 %v4557_v11  ;;  %v4554_v11 = vld [vmem:[%s6060_s1 + $0xaf0] ss:$24 sps:$4 sm:$0xff]  }
 0x155   :  { %2799 = vmatprep.subr.bf16.mxu0 %v4483_v7 }
 0x157   :  { %3894 = vmatpush3.bf16.msra.mxu1 %v4558_v15  ;;  %v4559_v15 = vld [vmem:[%s6060_s1 + $0xb20] ss:$24 sps:$4 sm:$0xff]  }
 0x158   :  { %2800 = vmatpush1.bf16.msra.mxu0 %v4481_v12  ;;  %3895 = vmatprep.subr.bf16.mxu1 %v4562_v16  ;;  %v4566_v16 = vld [vmem:[%s6060_s1 + $0xb54] ss:$24 sps:$4 sm:$0xff]  }
 0x159   :  { %2801 = vmatprep.subr.bf16.mxu0 %v4486_v14  ;;  %v4561_v14 = vld [vmem:[%s6060_s1 + $0xb24] ss:$24 sps:$4 sm:$0xff]  }
 0x15b   :  { %3896 = vmatpush3.bf16.msra.mxu1 %v4563_v20 }
 0x15c   :  { %2802 = vmatpush1.bf16.msra.mxu0 %v4484_v17  ;;  %3897 = vmatprep.subr.bf16.mxu1 %v4567_v21  ;;  %v4564_v17 = vld [vmem:[%s6060_s1 + $0xb50] ss:$24 sps:$4 sm:$0xff]   ;;  %v4569_v21 = vld [vmem:[%s6060_s1 + $0xb80] ss:$24 sps:$4 sm:$0xff]  }
 0x15d   :  { %2803 = vmatprep.subr.bf16.mxu0 %v4489_v18  ;;  %v4571_v18 = vld [vmem:[%s6060_s1 + $0xb84] ss:$24 sps:$4 sm:$0xff]  }
 0x15f   :  { %3898 = vmatpush3.bf16.msra.mxu1 %v4568_v25 }
 0x160   :  { %2804 = vmatpush1.bf16.msra.mxu0 %v4487_v22  ;;  %3905 = vmatprep.subr.bf16.mxu1 %v4578_v13 }
 0x161   :  { %2805 = vmatprep.subr.bf16.mxu0 %v4492_v24  ;;  %v4574_v24 = vld [vmem:[%s6060_s1 + $0xbb4] ss:$24 sps:$4 sm:$0xff]  }
 0x164   :  { %2806 = vmatpush1.bf16.msra.mxu0 %v4490_v26  ;;  %v4579_v26 = vld [vmem:[%s6061_s2 + $0x80] sm:$0xff]  }
 0x165   :  { %2807 = vmatprep.subr.bf16.mxu0 %v4495_v27 }
 0x168   :  { %2808 = vmatpush1.bf16.msra.mxu0 %v4493_v28  ;;  %v4580_v28 = vld [vmem:[%s6061_s2 + $0xc8] sm:$0xff]  }
 0x169   :  { %2809 = vmatprep.subr.bf16.mxu0 %v4498_v29  ;;  %v4572_v29 = vld [vmem:[%s6060_s1 + $0xbb0] ss:$24 sps:$4 sm:$0xff]  }
 0x16c   :  { %2810 = vmatpush1.bf16.msra.mxu0 %v4496_v30  ;;  %v4577_v30 = vld [vmem:[%s6060_s1 + $0xbe4] ss:$24 sps:$4 sm:$0xff]  }
 0x16d   :  { %2811 = vmatprep.subr.bf16.mxu0 %v4501_v32  ;;  %v4581_v32 = vld [vmem:[%s6061_s2 + $0x88] sm:$0xff]  }
 0x170   :  { %2812 = vmatpush1.bf16.msra.mxu0 %v4499_v33  ;;  %v4582_v33 = vld [vmem:[%s6061_s2 + $0xd0] sm:$0xff]  }
 0x171   :  { %2813 = vmatprep.subr.bf16.mxu0 %v4504_v34  ;;  %v4575_v34 = vld [vmem:[%s6060_s1 + $0xbe0] ss:$24 sps:$4 sm:$0xff]  }
 0x174   :  { %2814 = vmatpush1.bf16.msra.mxu0 %v4502_v35  ;;  %v4583_v35 = vld [vmem:[%s6061_s2 + $0x90] sm:$0xff]  }
 0x175   :  { %2815 = vmatprep.subr.bf16.mxu0 %v4507_v37  ;;  %v4584_v37 = vld [vmem:[%s6061_s2 + $0xd8] sm:$0xff]  }
 0x178   :  { %2816 = vmatpush1.bf16.msra.mxu0 %v4505_v39  ;;  %v4585_v39 = vld [vmem:[%s6061_s2 + $0x98] sm:$0xff]  }
 0x179   :  { %2817 = vmatprep.subr.bf16.mxu0 %v4510_v40  ;;  %v4586_v40 = vld [vmem:[%s6061_s2 + $0xe0] sm:$0xff]  }
 0x17c   :  { %2818 = vmatpush1.bf16.msra.mxu0 %v4508_v41  ;;  %v4587_v41 = vld [vmem:[%s6061_s2 + $0xa0] sm:$0xff]  }
 0x17d   :  { %2819 = vmatprep.subr.bf16.mxu0 %v4513_v42  ;;  %v4588_v42 = vld [vmem:[%s6061_s2 + $0xe8] sm:$0xff]  }
 0x180   :  { %2820 = vmatpush1.bf16.msra.mxu0 %v4511_v43  ;;  %v4590_v43 = vld [vmem:[%s6061_s2 + $0xf0] sm:$0xff]  }
 0x181   :  { %2830 = vmatprep.subr.bf16.mxu0 %v4516_v44  ;;  %v4591_v44 = vld [vmem:[%s6061_s2 + $0xb0] sm:$0xff]  }
 0x183   :  { %2822 = vmatmul.mubr.bf16.vlgmr.msra.gmra.mrb[4].mxu0 %v4849_v63  ;;  %v4525_v63 = vld [vmem:[%s6060_s1 + $0x9a4] ss:$24 sps:$4 sm:$0xff]  }
 0x184   :  { %2831 = vmatpush1.bf16.msra.mxu0 %v4514_v45  ;;  %2862 = vmatprep.mubr.bf16.mxu0 %v5122_v31  ;;  %v4523_v31 = vld [vmem:[%s6060_s1 + $0x9a0] ss:$24 sps:$4 sm:$0xff]  }
 0x185   :  { %2832 = vmatprep.subr.bf16.mxu0 %v4519_v46  ;;  %v4592_v45 = vld [vmem:[%s6061_s2 + $0xf8] sm:$0xff]  }
 0x186   :  { %v4593_v46 = vld [vmem:[%s6061_s2 + $0xb8] sm:$0xff]  }
 0x188   :  { %2833 = vmatpush1.bf16.msra.mxu0 %v4517_v47 }
 0x189   :  { %2834 = vmatprep.subr.bf16.mxu0 %v4522_v48  ;;  %v4594_v48 = vld [vmem:[%s6061_s2 + $0x140] sm:$0xff]  }
 0x18c   :  { %2835 = vmatpush1.bf16.msra.mxu0 %v4520_v62 }
 0x18d   :  { %2836 = vmatprep.subr.bf16.mxu0 %v4525_v63 }
 0x190   :  { %2837 = vmatpush1.bf16.msra.mxu0 %v4523_v31 }
 0x191   :  { %2838 = vmatprep.subr.bf16.mxu0 %v4528_v49 }
 0x194   :  { %2839 = vmatpush1.bf16.msra.mxu0 %v4526_v50 }
 0x195   :  { %2840 = vmatprep.subr.bf16.mxu0 %v4531_v51 }
 0x196   :  { %v2536_v54 = vpop.f32.mrb[0].mxu0 }
 0x197   :  { %v3949_v55 = vadd.f32 %v2536_v54, %v5590_v8  ;;  %v2538_v56 = vpop.f32.mrb[1].mxu0 }
 0x198   :  { %v3950_v3 = vadd.f32 %v2538_v56, %v5595_v10  ;;  %v2540_v57 = vpop.f32.mrb[2].mxu0  ;;  %2841 = vmatpush1.bf16.msra.mxu0 %v4529_v52  ;;  %v4539_v10 = vld [vmem:[%s6060_s1 + $0xa60] ss:$24 sps:$4 sm:$0xff]  }
 0x199   :  { %v2871_v59 = vsub.f32 0.0, %v3949_v55  ;;  %v2541_v19 = vpop.f32.mrb[3].mxu0  ;;  %2842 = vmatprep.subr.bf16.mxu0 %v4536_v53 }
 0x19a   :  { %v2872_v60 = vsub.f32 0.0, %v3950_v3  ;;  %v4596_v19 = vld [vmem:[%s6061_s2 + $0x148] sm:$0xff]  }
 0x19b   :  { %v2877_v61 = vmul.f32 1.442695, %v2871_v59 }
 0x19c   :  { %v2879_v8 = vmul.f32 1.442695, %v2872_v60  ;;  %2843 = vmatpush1.bf16.msra.mxu0 %v4534_v58  ;;  %v4595_v58 = vld [vmem:[%s6061_s2 + $0x100] sm:$0xff]   ;;  %v4598_v60 = vld [vmem:[%s6061_s2 + $0x150] sm:$0xff]  }
 0x19d   :  { %4610 = vpow2.f32 %v2877_v61  ;;  %2844 = vmatprep.subr.bf16.mxu0 %v4541_v23  ;;  %v4597_v23 = vld [vmem:[%s6061_s2 + $0x108] sm:$0xff]   ;;  %v4599_v61 = vld [vmem:[%s6061_s2 + $0x110] sm:$0xff]  }
 0x19e   :  { %4612 = vpow2.f32 %v2879_v8  ;;  %v4600_v8 = vld [vmem:[%s6061_s2 + $0x158] sm:$0xff]  }
 0x1a0   :  { %2845 = vmatpush1.bf16.msra.mxu0 %v4539_v10  ;;  %v4601_v10 = vld [vmem:[%s6061_s2 + $0x118] sm:$0xff]  }
 0x1a1   :  { %2846 = vmatprep.subr.bf16.mxu0 %v4546_v0  ;;  %v4602_v0 = vld [vmem:[%s6061_s2 + $0x160] sm:$0xff]  }
 0x1a4   :  { %2847 = vmatpush1.bf16.msra.mxu0 %v4544_v1  ;;  %v4603_v1 = vld [vmem:[%s6061_s2 + $0x120] sm:$0xff]  }
 0x1a5   :  { %2848 = vmatprep.subr.bf16.mxu0 %v4551_v2  ;;  %v4604_v2 = vld [vmem:[%s6061_s2 + $0x168] sm:$0xff]  }
 0x1a7   :  { %v4611_v6 = vpop.eup %4610 }
 0x1a8   :  { %v4613_v7 = vpop.eup %4612  ;;  %v2889_v9 = vadd.f32 1.0, %v4611_v6  ;;  %2849 = vmatpush1.bf16.msra.mxu0 %v4549_v4  ;;  %v4605_v4 = vld [vmem:[%s6061_s2 + $0x128] sm:$0xff]   ;;  %v4607_v6 = vld [vmem:[%s6061_s2 + $0x130] sm:$0xff]  }
 0x1a9   :  { %v2890_v12 = vadd.f32 1.0, %v4613_v7  ;;  %2850 = vmatprep.subr.bf16.mxu0 %v4556_v5  ;;  %v4606_v5 = vld [vmem:[%s6061_s2 + $0x170] sm:$0xff]   ;;  %v4608_v7 = vld [vmem:[%s6061_s2 + $0x178] sm:$0xff]  }
 0x1aa   :  { %4614 = vrcp.f32 %v2889_v9  ;;  %v4609_v9 = vld [vmem:[%s6061_s2 + $0x138] sm:$0xff]  }
 0x1ab   :  { %4616 = vrcp.f32 %v2890_v12 }
 0x1ac   :  { %2851 = vmatpush1.bf16.msra.mxu0 %v4554_v11 }
 0x1ad   :  { %2852 = vmatprep.subr.bf16.mxu0 %v4561_v14 }
 0x1b0   :  { %2853 = vmatpush1.bf16.msra.mxu0 %v4559_v15 }
 0x1b1   :  { %2854 = vmatprep.subr.bf16.mxu0 %v4566_v16 }
 0x1b4   :  { %v4615_v20 = vpop.eup %4614  ;;  %2855 = vmatpush1.bf16.msra.mxu0 %v4564_v17 }
 0x1b5   :  { %v4617_v22 = vpop.eup %4616  ;;  %2856 = vmatprep.subr.bf16.mxu0 %v4571_v18  ;;  %v2920_v27 = vpack.c.bf16 %v4615_v20, %v4615_v20 }
 0x1b6   :  { %v2921_v25 = vpack.c.bf16 %v4617_v22, %v4617_v22 }
 0x1b8   :  { %2857 = vmatpush1.bf16.msra.mxu0 %v4569_v21  ;;  %3342 = vmatprep.mubr.bf16.mxu1 %v2921_v25 }
 0x1b9   :  { %3343 = vmatmul.mubr.bf16.vlgmr.msra.gmra.mrb[8].mxu1 %v2920_v27  ;;  %2858 = vmatprep.subr.bf16.mxu0 %v4574_v24 }
 0x1ba   :  { %3906 = vmatpush3.bf16.msra.mxu1 %v4579_v26 }
 0x1bb   :  { %3907 = vmatprep.subr.bf16.mxu1 %v4580_v28 }
 0x1bc   :  { %2859 = vmatpush1.bf16.msra.mxu0 %v4572_v29 }
 0x1bd   :  { %2860 = vmatprep.subr.bf16.mxu0 %v4577_v30 }
 0x1be   :  { %3908 = vmatpush3.bf16.msra.mxu1 %v4581_v32  ;;  %v2902_v32 = vand.u32 127, %v406_v38 }
 0x1bf   :  { %3909 = vmatprep.subr.bf16.mxu1 %v4582_v33 }
 0x1c0   :  { %2861 = vmatpush1.bf16.msra.mxu0 %v4575_v34  ;;  %v2907_v33 = vadd.s32 640, %v2902_v32 }
 0x1c2   :  { %3910 = vmatpush3.bf16.msra.mxu1 %v4583_v35  ;;  %vm2913_vm0 = vcmp.eq.s32.totalorder %v2907_v33, 767 }
 0x1c3   :  { %2863 = vmatmul.mubr.bf16.vlgmr.msra.gmra.mrb[4].mxu0 %v5310_v36  ;;  %3911 = vmatprep.subr.bf16.mxu1 %v4584_v37  ;;  %v4589_v36 = vld [vmem:[%s6061_s2 + $0xa8] sm:$0xff]   ;;  %s4663_s2 = smov [#allocation2]  }
 0x1c4   :  { %s3443_s11 = sshll.u32 %s4663_s2, 4  ;;  %s3444_s11 = int_to_ptr.vmem [resolvable:$true] %s3443_s11 }
 0x1c5   :  { %s4638_s12 = scalar_lea.vmem %s3444_s11, 32  ;;  %p4643_p1 = scmp.lt.s32.totalorder %s3444_s11, %s3444_s11 }
 0x1c6   :  { %3912 = vmatpush3.bf16.msra.mxu1 %v4585_v39  ;;  %p4639_p0 = scmp.ne.s32.totalorder %s3444_s11, %s4638_s12  ;;  %p4644_p2 = scmp.lt.s32.totalorder %s4638_s12, %s4638_s12 }
 0x1c7   :  { %3913 = vmatprep.subr.bf16.mxu1 %v4586_v40 }
 0x1c8   :  { %p4645_p3 = por %p4644_p2, %p4643_p1 }
 0x1ca   :  { %3914 = vmatpush3.bf16.msra.mxu1 %v4587_v41  ;;  %p4646_p4 = pnand %p4645_p3, %p4639_p0 }
 0x1cb   :  { %3915 = vmatprep.subr.bf16.mxu1 %v4588_v42 }
 0x1ce   :  { %3916 = vmatpush3.bf16.msra.mxu1 %v4589_v36 }
 0x1cf   :  { %3917 = vmatprep.subr.bf16.mxu1 %v4590_v43 }
 0x1d2   :  { %3918 = vmatpush3.bf16.msra.mxu1 %v4591_v44 }
 0x1d3   :  { %3919 = vmatprep.subr.bf16.mxu1 %v4592_v45 }
 0x1d6   :  { %3920 = vmatpush3.bf16.msra.mxu1 %v4593_v46 }
 0x1d7   :  { %3927 = vmatprep.subr.bf16.mxu1 %v4594_v48 }
 0x215   :  { %v2700_v47 = vpop.f32.mrb[4].mxu1 }
 0x216   :  { %v2873_v62 = vsub.f32 0.0, %v2700_v47  ;;  %v2702_v63 = vpop.f32.mrb[5].mxu1 }
 0x217   :  { %v2874_v31 = vsub.f32 0.0, %v2702_v63  ;;  %v2704_v49 = vpop.f32.mrb[6].mxu1 }
 0x218   :  { %v2881_v50 = vmul.f32 1.442695, %v2873_v62  ;;  %v2705_v51 = vpop.f32.mrb[7].mxu1 }
 0x219   :  { %v2883_v52 = vmul.f32 1.442695, %v2874_v31 }
 0x21a   :  { %4618 = vpow2.f32 %v2881_v50 }
 0x21b   :  { %4620 = vpow2.f32 %v2883_v52 }
 0x224   :  { %v4619_v53 = vpop.eup %4618 }
 0x225   :  { %v4621_v13 = vpop.eup %4620  ;;  %v2891_v54 = vadd.f32 1.0, %v4619_v53 }
 0x226   :  { %v2892_v55 = vadd.f32 1.0, %v4621_v13 }
 0x227   :  { %4622 = vrcp.f32 %v2891_v54 }
 0x228   :  { %4624 = vrcp.f32 %v2892_v55 }
 0x231   :  { %v4623_v56 = vpop.eup %4622 }
 0x232   :  { %v4625_v3 = vpop.eup %4624  ;;  %v2922_v59 = vpack.c.bf16 %v4623_v56, %v4623_v56 }
 0x233   :  { %v2923_v57 = vpack.c.bf16 %v4625_v3, %v4625_v3 }
 0x235   :  { %3382 = vmatprep.mubr.bf16.mxu1 %v2923_v57 }
 0x236   :  { %3383 = vmatmul.mubr.bf16.vlgmr.msra.gmra.mrb[12].mxu1 %v2922_v59 }
 0x237   :  { %3928 = vmatpush3.bf16.msra.mxu1 %v4595_v58 }
 0x238   :  { %3929 = vmatprep.subr.bf16.mxu1 %v4596_v19 }
 0x23b   :  { %3930 = vmatpush3.bf16.msra.mxu1 %v4597_v23 }
 0x23c   :  { %3931 = vmatprep.subr.bf16.mxu1 %v4598_v60 }
 0x23f   :  { %3932 = vmatpush3.bf16.msra.mxu1 %v4599_v61 }
 0x240   :  { %3933 = vmatprep.subr.bf16.mxu1 %v4600_v8 }
 0x243   :  { %3934 = vmatpush3.bf16.msra.mxu1 %v4601_v10 }
 0x244   :  { %3935 = vmatprep.subr.bf16.mxu1 %v4602_v0 }
 0x247   :  { %3936 = vmatpush3.bf16.msra.mxu1 %v4603_v1 }
 0x248   :  { %3937 = vmatprep.subr.bf16.mxu1 %v4604_v2 }
 0x24b   :  { %3938 = vmatpush3.bf16.msra.mxu1 %v4605_v4 }
 0x24c   :  { %3939 = vmatprep.subr.bf16.mxu1 %v4606_v5 }
 0x24f   :  { %3940 = vmatpush3.bf16.msra.mxu1 %v4607_v6 }
 0x250   :  { %3941 = vmatprep.subr.bf16.mxu1 %v4608_v7 }
 0x253   :  { %3942 = vmatpush3.bf16.msra.mxu1 %v4609_v9 }
 0x28c   :  { %v3899_v11 = vpop.f32.mrb[8].mxu1 }
 0x28d   :  { %v3900_v12 = vpop.f32.mrb[9].mxu1 }
 0x28e   :  { %v3901_v14 = vadd.f32 %v3900_v12, %v3899_v11  ;;  %v3902_v15 = vpop.f32.mrb[10].mxu1 }
 0x28f   :  { %v3903_v16 = vpop.f32.mrb[11].mxu1 }
 0x296   :  { %v2864_v17 = vpop.f32.mrb[4].mxu0 }
 0x297   :  { %v2875_v18 = vsub.f32 0.0, %v2864_v17  ;;  %v2866_v20 = vpop.f32.mrb[5].mxu0 }
 0x298   :  { %v2876_v21 = vsub.f32 0.0, %v2866_v20  ;;  %v2868_v22 = vpop.f32.mrb[6].mxu0 }
 0x299   :  { %v2885_v24 = vmul.f32 1.442695, %v2875_v18  ;;  %v2869_v25 = vpop.f32.mrb[7].mxu0 }
 0x29a   :  { %v2887_v26 = vmul.f32 1.442695, %v2876_v21 }
 0x29b   :  { %4626 = vpow2.f32 %v2885_v24 }
 0x29c   :  { %4628 = vpow2.f32 %v2887_v26 }
 0x2a5   :  { %v4627_v27 = vpop.eup %4626 }
 0x2a6   :  { %v4629_v28 = vpop.eup %4628  ;;  %v2893_v29 = vadd.f32 1.0, %v4627_v27 }
 0x2a7   :  { %v2894_v30 = vadd.f32 1.0, %v4629_v28 }
 0x2a8   :  { %4630 = vrcp.f32 %v2893_v29 }
 0x2a9   :  { %4632 = vrcp.f32 %v2894_v30 }
 0x2b2   :  { %v4631_v34 = vpop.eup %4630 }
 0x2b3   :  { %v4633_v35 = vpop.eup %4632  ;;  %v2924_v40 = vpack.c.bf16 %v4631_v34, %v4631_v34 }
 0x2b4   :  { %v2919_v37 = vsel %vm2913_vm0, 1.0, %v4633_v35 }
 0x2b5   :  { %v2925_v39 = vpack.c.bf16 %v2919_v37, %v2919_v37 }
 0x2b7   :  { %3422 = vmatprep.mubr.bf16.mxu1 %v2925_v39 }
 0x2b8   :  { %3423 = vmatmul.mubr.bf16.vlgmr.msra.gmra.mrb[16].mxu1 %v2924_v40 }
 0x309   :  { %v3921_v41 = vpop.f32.mrb[12].mxu1 }
 0x30a   :  { %v3922_v42 = vpop.f32.mrb[13].mxu1 }
 0x30b   :  { %v3923_v36 = vadd.f32 %v3922_v42, %v3921_v41  ;;  %v3924_v43 = vpop.f32.mrb[14].mxu1 }
 0x30c   :  { %v3925_v44 = vpop.f32.mrb[15].mxu1 }
 0x30d   :  { %v3385_v45 = vadd.f32 %v3923_v36, %v3901_v14 }
 0x38b   :  { %v3943_v46 = vpop.f32.mrb[16].mxu1 }
 0x38c   :  { %v3944_v47 = vpop.f32.mrb[17].mxu1 }
 0x38d   :  { %v3945_v48 = vadd.f32 %v3944_v47, %v3943_v46  ;;  %v3946_v62 = vpop.f32.mrb[18].mxu1 }
 0x38e   :  { %v3947_v38 = vpop.f32.mrb[19].mxu1 }
 0x38f   :  { %v3425_v63 = vadd.f32 %v3945_v48, %v3385_v45 }
 0x391   :  { %v3430_v31 = vsub.f32 0.0, %v3425_v63 }
 0x393   :  { %v3431_v49 = vmul.f32 1.442695, %v3430_v31 }
 0x395   :  { %4634 = vpow2.f32 %v3431_v49 }
 0x39f   :  { %v4635_v50 = vpop.eup %4634 }
 0x3a0   :  { %v3433_v51 = vadd.f32 1.0, %v4635_v50 }
 0x3a2   :  { %4636 = vrcp.f32 %v3433_v51 }
 0x3ac   :  { %v4637_v52 = vpop.eup %4636 }
 0x3ad   :  { %3436 = vst [vmem:[#allocation2] sm:$0x3] %v4637_v52 }
 0x3ae   :  { %4649 = shalt.err (!%p4646_p4)
}
 0x3af   :  { %s4650_s15 = scalar_lea.hbm %s6062_s3, 32 }
 0x3b0   :  { %p4651_p5 = scmp.ne.s32.totalorder %s6062_s3, %s4650_s15  ;;  %p4654_p6 = scmp.lt.u32.totalorder %s4650_s15, %s6062_s3 }
 0x3b2   :  { %p4656_p7 = pnand %p4654_p6, %p4651_p5 }
 0x3b4   :  { %4659 = shalt.err (!%p4656_p7)
}
 0x3b5   :  { %3446 = dma.vmem_to_hbm [thread:$0]  %s3444_s11, 32, %s6062_s3, [#allocation3]  }
 0x3b6   :  { %4660 = dma.done.wait [#allocation3], 32  }
 0x3b7   :  { %4661 = vsyncadd [#allocation3], 4294967264 }
 0x3b8   :  { %3450 = vsyncpa [#allocation3], 1 }

</bundles_post_ra>
